<compile_context>
chip_gen: v7x
topology: tpu7x:2x2x1
jax: 0.10.0
libtpu: 0.0.40
codegen_flags: <defaults>
</compile_context>

<pallas_src>
import math

import jax
import jax.numpy as jnp
from jax import lax
from jax.experimental import pallas as pl
from jax.experimental.pallas import tpu as pltpu


# ----------------------------------------------------------------------------
# Fused Critic kernel factory.
# Ref order: x2d, action, [w_ih, w_hh, b_ih, b_hh] * L,
#            w1_emb, w1_act, b1, [g1, beta1], [w, b, g, beta] * (nhb-1),
#            [w_out, b_out], out_ref, gi_scratch, seq_scratch
# ----------------------------------------------------------------------------
def make_critic_kernel(num_gru_layers, num_hidden_blocks, seq_len, batch, hidden):
    T, B, H = seq_len, batch, hidden

    def mm(x, w_ref):
        w = w_ref[...]
        return jnp.dot(x.astype(w.dtype), w, preferred_element_type=jnp.float32)

    def layer_norm_relu(x, gamma, beta, eps=1e-5):
        mean = jnp.mean(x, axis=-1, keepdims=True)
        var = jnp.mean((x - mean) ** 2, axis=-1, keepdims=True)
        x = (x - mean) * lax.rsqrt(var + eps) * gamma + beta
        return jnp.maximum(x, 0.0)

    def kernel(*refs):
        idx = 0
        x2d_ref = refs[idx]; idx += 1          # (T*B, D_state), time-major rows
        action_ref = refs[idx]; idx += 1       # (B, D_act)
        gru_refs = []
        for _ in range(num_gru_layers):
            gru_refs.append(refs[idx:idx + 4]); idx += 4
        w1e_ref, w1a_ref, b1_ref = refs[idx:idx + 3]; idx += 3
        if num_hidden_blocks >= 1:
            g1_ref, beta1_ref = refs[idx:idx + 2]; idx += 2
        rest_refs = []
        for _ in range(max(num_hidden_blocks - 1, 0)):
            rest_refs.append(refs[idx:idx + 4]); idx += 4
        if num_hidden_blocks >= 1:
            wout_ref, bout_ref = refs[idx:idx + 2]; idx += 2
        out_ref = refs[idx]; idx += 1
        gi_ref = refs[idx]; idx += 1            # (T*B, 3H) scratch
        seq_ref = refs[idx]; idx += 1           # (T*B, H)  scratch (inter-layer seq)

        # ------------------------- GRU encoder -------------------------------
        h = jnp.zeros((B, H), jnp.float32)
        for layer in range(num_gru_layers):
            w_ih_ref, w_hh_ref, b_ih_ref, b_hh_ref = gru_refs[layer]
            is_last = layer == num_gru_layers - 1

            # Hoisted input projection for the whole sequence: one matmul,
            # input bias folded in.  Rows are time-major: row t*B + b.
            x2d = x2d_ref[...] if layer == 0 else seq_ref[...]
            gi_ref[...] = mm(x2d, w_ih_ref) + b_ih_ref[...].astype(jnp.float32)

            w_hh = w_hh_ref[...]
            b_hh = jnp.broadcast_to(b_hh_ref[...].astype(jnp.float32), (B, 3 * H))

            h = jnp.zeros((B, H), jnp.float32)
            # Fully unrolled recurrence: one h @ W_hh matmul per step.
            for t in range(T):
                gi_t = gi_ref[pl.ds(t * B, B), :]                    # (B, 3H)
                gh = jnp.dot(h.astype(w_hh.dtype), w_hh,
                             preferred_element_type=jnp.float32) + b_hh
                r = jax.nn.sigmoid(gi_t[:, :H] + gh[:, :H])
                z = jax.nn.sigmoid(gi_t[:, H:2 * H] + gh[:, H:2 * H])
                n = jnp.tanh(gi_t[:, 2 * H:] + r * gh[:, 2 * H:])
                h = (1.0 - z) * n + z * h
                if not is_last:                                      # skip on last layer
                    seq_ref[pl.ds(t * B, B), :] = h

        # ------------------------- MLP decoder -------------------------------
        # concat(embedding, action) @ W1 == emb @ W1[:H] + action @ W1[H:]
        x = (mm(h, w1e_ref) + mm(action_ref[...], w1a_ref)
             + b1_ref[...].astype(jnp.float32))
        if num_hidden_blocks >= 1:
            x = layer_norm_relu(x, g1_ref[...].astype(jnp.float32),
                                beta1_ref[...].astype(jnp.float32))
            for (w_ref, b_ref, g_ref, beta_ref) in rest_refs:
                x = mm(x, w_ref) + b_ref[...].astype(jnp.float32)
                x = layer_norm_relu(x, g_ref[...].astype(jnp.float32),
                                    beta_ref[...].astype(jnp.float32))
            x = mm(x, wout_ref) + bout_ref[...].astype(jnp.float32)
        out_ref[...] = x.astype(out_ref.dtype)

    return kernel


# ----------------------------------------------------------------------------
# Wrapper: single fused pallas_call (everything resident in VMEM, no grid).
# ----------------------------------------------------------------------------
def critic_forward(state, action, gru_params, mlp_params):
    """state: (B, T, D_state) batch-first (like PyTorch); action: (B, D_act)."""
    B, T, D = state.shape
    H = gru_params[0]["w_hh"].shape[0]
    hidden_blocks, (w_out, b_out) = mlp_params
    nhb = len(hidden_blocks)
    out_dim = w_out.shape[-1]

    # Pad batch to a sublane multiple so all in-kernel slices are tile-aligned.
    B_pad = ((B + 7) // 8) * 8
    if B_pad != B:
        state = jnp.pad(state, ((0, B_pad - B), (0, 0), (0, 0)))
        action = jnp.pad(action, ((0, B_pad - B), (0, 0)))

    # Time-major flattened input rows (row index = t*B_pad + b).
    x2d = jnp.transpose(state, (1, 0, 2)).reshape(T * B_pad, D).astype(jnp.float32)
    action = action.astype(jnp.float32)

    flat = [x2d, action]
    for p in gru_params:
        flat += [p["w_ih"], p["w_hh"], p["b_ih"], p["b_hh"]]

    # Split the first MLP linear into embedding / action parts (replaces concat).
    if nhb >= 1:
        w1, b1, g1, beta1 = hidden_blocks[0]
    else:
        w1, b1 = w_out, b_out
    flat += [w1[:H, :], w1[H:, :], b1]
    if nhb >= 1:
        flat += [g1, beta1]
        for blk in hidden_blocks[1:]:
            flat += list(blk)
        flat += [w_out, b_out]

    kernel = make_critic_kernel(len(gru_params), nhb, T, B_pad, H)
    out = pl.pallas_call(
        kernel,
        out_shape=jax.ShapeDtypeStruct((B_pad, out_dim), jnp.float32),
        in_specs=[pl.BlockSpec(memory_space=pltpu.MemorySpace.VMEM)] * len(flat),
        out_specs=pl.BlockSpec(memory_space=pltpu.MemorySpace.VMEM),
        scratch_shapes=[
            pltpu.VMEM((T * B_pad, 3 * H), jnp.float32),   # hoisted input projection
            pltpu.VMEM((T * B_pad, H), jnp.float32),       # inter-layer sequence
        ],
    )(*flat)
    return out[:B]


# ----------------------------------------------------------------------------
# Parameter construction (fused gate layout; shapes follow nn.GRU / Linear / LN).
# Pass param_dtype=jnp.bfloat16 on v6e/v7x to use the bf16 MXU path.
# ----------------------------------------------------------------------------
def init_params(key, state_input_dim, action_input_dim, output_dim,
                embedding_dim, hidden_dim, encoder_layers, decoder_layers,
                param_dtype=jnp.float32):
    gru_params = []
    k = 1.0 / math.sqrt(embedding_dim)
    for layer in range(encoder_layers):
        d_in = state_input_dim if layer == 0 else embedding_dim
        key, k1, k2, k3, k4 = jax.random.split(key, 5)
        gru_params.append(dict(
            w_ih=jax.random.uniform(k1, (d_in, 3 * embedding_dim), jnp.float32, -k, k).astype(param_dtype),
            w_hh=jax.random.uniform(k2, (embedding_dim, 3 * embedding_dim), jnp.float32, -k, k).astype(param_dtype),
            b_ih=jax.random.uniform(k3, (1, 3 * embedding_dim), jnp.float32, -k, k).astype(param_dtype),
            b_hh=jax.random.uniform(k4, (1, 3 * embedding_dim), jnp.float32, -k, k).astype(param_dtype),
        ))

    dim_list = [embedding_dim + action_input_dim] + [hidden_dim] * decoder_layers + [output_dim]
    hidden_blocks = []
    for i in range(len(dim_list) - 2):
        d_in, d_out = dim_list[i], dim_list[i + 1]
        kl = 1.0 / math.sqrt(d_in)
        key, k1, k2 = jax.random.split(key, 3)
        w = jax.random.uniform(k1, (d_in, d_out), jnp.float32, -kl, kl).astype(param_dtype)
        b = jax.random.uniform(k2, (1, d_out), jnp.float32, -kl, kl).astype(param_dtype)
        gamma = jnp.ones((1, d_out), param_dtype)
        beta = jnp.zeros((1, d_out), param_dtype)
        hidden_blocks.append((w, b, gamma, beta))
    d_in, d_out = dim_list[-2], dim_list[-1]
    kl = 1.0 / math.sqrt(d_in)
    key, k1, k2 = jax.random.split(key, 3)
    w_out = jax.random.uniform(k1, (d_in, d_out), jnp.float32, -kl, kl).astype(param_dtype)
    b_out = jax.random.uniform(k2, (1, d_out), jnp.float32, -kl, kl).astype(param_dtype)
    return gru_params, (hidden_blocks, (w_out, b_out))


# ----------------------------------------------------------------------------
# Pure-JAX reference (mirrors torch.nn.GRU / Sequential semantics).
# ----------------------------------------------------------------------------
def critic_ref(state, action, gru_params, mlp_params):
    B, T, _ = state.shape
    x = state.astype(jnp.float32)
    for p in gru_params:
        H = p["w_hh"].shape[0]
        w_ih = p["w_ih"].astype(jnp.float32); w_hh = p["w_hh"].astype(jnp.float32)
        b_ih = p["b_ih"].astype(jnp.float32); b_hh = p["b_hh"].astype(jnp.float32)
        h = jnp.zeros((B, H), jnp.float32)
        outs = []
        for t in range(T):
            gi = x[:, t, :] @ w_ih + b_ih
            gh = h @ w_hh + b_hh
            r = jax.nn.sigmoid(gi[:, :H] + gh[:, :H])
            z = jax.nn.sigmoid(gi[:, H:2 * H] + gh[:, H:2 * H])
            n = jnp.tanh(gi[:, 2 * H:] + r * gh[:, 2 * H:])
            h = (1.0 - z) * n + z * h
            outs.append(h)
        x = jnp.stack(outs, axis=1)
    emb = x[:, -1, :]

    hidden_blocks, (w_out, b_out) = mlp_params
    h = jnp.concatenate([emb, action.astype(jnp.float32)], axis=-1)
    for (w, b, g, beta) in hidden_blocks:
        h = h @ w.astype(jnp.float32) + b.astype(jnp.float32)
        mean = jnp.mean(h, axis=-1, keepdims=True)
        var = jnp.mean((h - mean) ** 2, axis=-1, keepdims=True)
        h = (h - mean) / jnp.sqrt(var + 1e-5) * g.astype(jnp.float32) + beta.astype(jnp.float32)
        h = jnp.maximum(h, 0.0)
    return h @ w_out.astype(jnp.float32) + b_out.astype(jnp.float32)


if __name__ == "__main__":
    B, T = 2, 8
    state_input_dim = 6
    action_input_dim = 4
    output_dim = 1
    embedding_dim = 32
    hidden_dim = 32
    encoder_layers = 2
    decoder_layers = 2

    key = jax.random.PRNGKey(0)
    key, ks, ka, kp = jax.random.split(key, 4)
    state = jax.random.normal(ks, (B, T, state_input_dim), jnp.float32)
    action = jax.random.normal(ka, (B, action_input_dim), jnp.float32)

    gru_params, mlp_params = init_params(
        kp, state_input_dim, action_input_dim, output_dim,
        embedding_dim, hidden_dim, encoder_layers, decoder_layers)

    fwd = jax.jit(critic_forward)
    reward = jax.block_until_ready(fwd(state, action, gru_params, mlp_params))

    ref = jax.block_until_ready(critic_ref(state, action, gru_params, mlp_params))
    assert reward.shape == (B, output_dim)
    assert jnp.allclose(reward, ref, atol=5e-3, rtol=5e-3), (reward, ref)

    print("KERNEL_OK")
</pallas_src>

<mosaic_0001>
module attributes {stable_mosaic.version = 11 : i64} {
  func.func @kernel(%arg0: memref<64x6xf32, #tpu.memory_space<vmem>>, %arg1: memref<8x4xf32, #tpu.memory_space<vmem>>, %arg2: memref<6x96xf32, #tpu.memory_space<vmem>>, %arg3: memref<32x96xf32, #tpu.memory_space<vmem>>, %arg4: memref<1x96xf32, #tpu.memory_space<vmem>>, %arg5: memref<1x96xf32, #tpu.memory_space<vmem>>, %arg6: memref<32x96xf32, #tpu.memory_space<vmem>>, %arg7: memref<32x96xf32, #tpu.memory_space<vmem>>, %arg8: memref<1x96xf32, #tpu.memory_space<vmem>>, %arg9: memref<1x96xf32, #tpu.memory_space<vmem>>, %arg10: memref<32x32xf32, #tpu.memory_space<vmem>>, %arg11: memref<4x32xf32, #tpu.memory_space<vmem>>, %arg12: memref<1x32xf32, #tpu.memory_space<vmem>>, %arg13: memref<1x32xf32, #tpu.memory_space<vmem>>, %arg14: memref<1x32xf32, #tpu.memory_space<vmem>>, %arg15: memref<32x32xf32, #tpu.memory_space<vmem>>, %arg16: memref<1x32xf32, #tpu.memory_space<vmem>>, %arg17: memref<1x32xf32, #tpu.memory_space<vmem>>, %arg18: memref<1x32xf32, #tpu.memory_space<vmem>>, %arg19: memref<32x1xf32, #tpu.memory_space<vmem>>, %arg20: memref<1x1xf32, #tpu.memory_space<vmem>>, %arg21: memref<8x1xf32, #tpu.memory_space<vmem>>, %arg22: memref<64x96xf32, #tpu.memory_space<vmem>>, %arg23: memref<64x32xf32, #tpu.memory_space<vmem>>) attributes {dimension_semantics = [], scalar_prefetch = 0 : i64, scratch_operands = 2 : i64, tpu.core_type = #tpu.core_type<tc>} {
    %c0 = arith.constant 0 : index
    %c0_0 = arith.constant 0 : index
    %0 = vector.load %arg0[%c0, %c0_0] : memref<64x6xf32, #tpu.memory_space<vmem>>, vector<64x6xf32>
    %c0_1 = arith.constant 0 : index
    %c0_2 = arith.constant 0 : index
    %1 = vector.load %arg2[%c0_1, %c0_2] : memref<6x96xf32, #tpu.memory_space<vmem>>, vector<6x96xf32>
    %cst = arith.constant dense<0.000000e+00> : vector<64x96xf32>
    %2 = tpu.matmul %0, %1, %cst {dimension_numbers = #tpu.dot_dimension_numbers<[1], [0], [0], [1], [0, 0, 1, 1], [], []>} : vector<64x6xf32>, vector<6x96xf32>, vector<64x96xf32> -> vector<64x96xf32>
    %c0_3 = arith.constant 0 : index
    %c0_4 = arith.constant 0 : index
    %3 = vector.load %arg4[%c0_3, %c0_4] : memref<1x96xf32, #tpu.memory_space<vmem>>, vector<1x96xf32>
    %4 = vector.broadcast %3 : vector<1x96xf32> to vector<64x96xf32>
    %5 = arith.addf %2, %4 : vector<64x96xf32>
    %c0_5 = arith.constant 0 : index
    %c0_6 = arith.constant 0 : index
    %6 = vector.load %arg22[%c0_5, %c0_6] : memref<64x96xf32, #tpu.memory_space<vmem>>, vector<64x96xf32>
    tpu.vector_store %arg22[%c0_5, %c0_6], %5 {strides = array<i32>} : memref<64x96xf32, #tpu.memory_space<vmem>>, vector<64x96xf32>,
    %c0_7 = arith.constant 0 : index
    %c0_8 = arith.constant 0 : index
    %7 = vector.load %arg3[%c0_7, %c0_8] : memref<32x96xf32, #tpu.memory_space<vmem>>, vector<32x96xf32>
    %c0_9 = arith.constant 0 : index
    %c0_10 = arith.constant 0 : index
    %8 = vector.load %arg5[%c0_9, %c0_10] : memref<1x96xf32, #tpu.memory_space<vmem>>, vector<1x96xf32>
    %9 = vector.shape_cast %8 : vector<1x96xf32> to vector<1x96xf32>
    %10 = vector.broadcast %9 : vector<1x96xf32> to vector<8x96xf32>
    %cst_11 = arith.constant 0.000000e+00 : f32
    %11 = vector.broadcast %cst_11 : f32 to vector<8x32xf32>
    %c0_12 = arith.constant 0 : index
    %c0_13 = arith.constant 0 : index
    %12 = vector.load %arg22[%c0_12, %c0_13] : memref<64x96xf32, #tpu.memory_space<vmem>>, vector<8x96xf32>
    %cst_14 = arith.constant dense<0.000000e+00> : vector<8x96xf32>
    %13 = tpu.matmul %11, %7, %cst_14 {dimension_numbers = #tpu.dot_dimension_numbers<[1], [0], [0], [1], [0, 0, 1, 1], [], []>} : vector<8x32xf32>, vector<32x96xf32>, vector<8x96xf32> -> vector<8x96xf32>
    %14 = arith.addf %13, %10 : vector<8x96xf32>
    %15 = vector.extract_strided_slice %12 {offsets = [0, 0], sizes = [8, 32], strides = [1, 1]} : vector<8x96xf32> to vector<8x32xf32>
    %16 = vector.extract_strided_slice %14 {offsets = [0, 0], sizes = [8, 32], strides = [1, 1]} : vector<8x96xf32> to vector<8x32xf32>
    %17 = arith.addf %15, %16 : vector<8x32xf32>
    %18 = arith.negf %17 : vector<8x32xf32>
    %19 = math.exp %18 : vector<8x32xf32>
    %cst_15 = arith.constant 1.000000e+00 : f32
    %20 = vector.broadcast %cst_15 : f32 to vector<8x32xf32>
    %21 = arith.addf %20, %19 : vector<8x32xf32>
    %22 = arith.divf %20, %21 : vector<8x32xf32>
    %23 = vector.extract_strided_slice %12 {offsets = [0, 32], sizes = [8, 32], strides = [1, 1]} : vector<8x96xf32> to vector<8x32xf32>
    %24 = vector.extract_strided_slice %14 {offsets = [0, 32], sizes = [8, 32], strides = [1, 1]} : vector<8x96xf32> to vector<8x32xf32>
    %25 = arith.addf %23, %24 : vector<8x32xf32>
    %26 = arith.negf %25 : vector<8x32xf32>
    %27 = math.exp %26 : vector<8x32xf32>
    %cst_16 = arith.constant 1.000000e+00 : f32
    %28 = vector.broadcast %cst_16 : f32 to vector<8x32xf32>
    %29 = arith.addf %28, %27 : vector<8x32xf32>
    %30 = arith.divf %28, %29 : vector<8x32xf32>
    %31 = vector.extract_strided_slice %12 {offsets = [0, 64], sizes = [8, 32], strides = [1, 1]} : vector<8x96xf32> to vector<8x32xf32>
    %32 = vector.extract_strided_slice %14 {offsets = [0, 64], sizes = [8, 32], strides = [1, 1]} : vector<8x96xf32> to vector<8x32xf32>
    %33 = arith.mulf %22, %32 : vector<8x32xf32>
    %34 = arith.addf %31, %33 : vector<8x32xf32>
    %35 = math.tanh %34 : vector<8x32xf32>
    %cst_17 = arith.constant 1.000000e+00 : f32
    %36 = vector.broadcast %cst_17 : f32 to vector<8x32xf32>
    %37 = arith.subf %36, %30 : vector<8x32xf32>
    %38 = arith.mulf %37, %35 : vector<8x32xf32>
    %39 = arith.mulf %30, %11 : vector<8x32xf32>
    %40 = arith.addf %38, %39 : vector<8x32xf32>
    %c0_18 = arith.constant 0 : index
    %c0_19 = arith.constant 0 : index
    %41 = vector.load %arg23[%c0_18, %c0_19] : memref<64x32xf32, #tpu.memory_space<vmem>>, vector<8x32xf32>
    tpu.vector_store %arg23[%c0_18, %c0_19], %40 {strides = array<i32>} : memref<64x32xf32, #tpu.memory_space<vmem>>, vector<8x32xf32>,
    %c8 = arith.constant 8 : index
    %c0_20 = arith.constant 0 : index
    %42 = vector.load %arg22[%c8, %c0_20] : memref<64x96xf32, #tpu.memory_space<vmem>>, vector<8x96xf32>
    %cst_21 = arith.constant dense<0.000000e+00> : vector<8x96xf32>
    %43 = tpu.matmul %40, %7, %cst_21 {dimension_numbers = #tpu.dot_dimension_numbers<[1], [0], [0], [1], [0, 0, 1, 1], [], []>} : vector<8x32xf32>, vector<32x96xf32>, vector<8x96xf32> -> vector<8x96xf32>
    %44 = arith.addf %43, %10 : vector<8x96xf32>
    %45 = vector.extract_strided_slice %42 {offsets = [0, 0], sizes = [8, 32], strides = [1, 1]} : vector<8x96xf32> to vector<8x32xf32>
    %46 = vector.extract_strided_slice %44 {offsets = [0, 0], sizes = [8, 32], strides = [1, 1]} : vector<8x96xf32> to vector<8x32xf32>
    %47 = arith.addf %45, %46 : vector<8x32xf32>
    %48 = arith.negf %47 : vector<8x32xf32>
    %49 = math.exp %48 : vector<8x32xf32>
    %cst_22 = arith.constant 1.000000e+00 : f32
    %50 = vector.broadcast %cst_22 : f32 to vector<8x32xf32>
    %51 = arith.addf %50, %49 : vector<8x32xf32>
    %52 = arith.divf %50, %51 : vector<8x32xf32>
    %53 = vector.extract_strided_slice %42 {offsets = [0, 32], sizes = [8, 32], strides = [1, 1]} : vector<8x96xf32> to vector<8x32xf32>
    %54 = vector.extract_strided_slice %44 {offsets = [0, 32], sizes = [8, 32], strides = [1, 1]} : vector<8x96xf32> to vector<8x32xf32>
    %55 = arith.addf %53, %54 : vector<8x32xf32>
    %56 = arith.negf %55 : vector<8x32xf32>
    %57 = math.exp %56 : vector<8x32xf32>
    %cst_23 = arith.constant 1.000000e+00 : f32
    %58 = vector.broadcast %cst_23 : f32 to vector<8x32xf32>
    %59 = arith.addf %58, %57 : vector<8x32xf32>
    %60 = arith.divf %58, %59 : vector<8x32xf32>
    %61 = vector.extract_strided_slice %42 {offsets = [0, 64], sizes = [8, 32], strides = [1, 1]} : vector<8x96xf32> to vector<8x32xf32>
    %62 = vector.extract_strided_slice %44 {offsets = [0, 64], sizes = [8, 32], strides = [1, 1]} : vector<8x96xf32> to vector<8x32xf32>
    %63 = arith.mulf %52, %62 : vector<8x32xf32>
    %64 = arith.addf %61, %63 : vector<8x32xf32>
    %65 = math.tanh %64 : vector<8x32xf32>
    %cst_24 = arith.constant 1.000000e+00 : f32
    %66 = vector.broadcast %cst_24 : f32 to vector<8x32xf32>
    %67 = arith.subf %66, %60 : vector<8x32xf32>
    %68 = arith.mulf %67, %65 : vector<8x32xf32>
    %69 = arith.mulf %60, %40 : vector<8x32xf32>
    %70 = arith.addf %68, %69 : vector<8x32xf32>
    %c8_25 = arith.constant 8 : index
    %c0_26 = arith.constant 0 : index
    %71 = vector.load %arg23[%c8_25, %c0_26] : memref<64x32xf32, #tpu.memory_space<vmem>>, vector<8x32xf32>
    tpu.vector_store %arg23[%c8_25, %c0_26], %70 {strides = array<i32>} : memref<64x32xf32, #tpu.memory_space<vmem>>, vector<8x32xf32>,
    %c16 = arith.constant 16 : index
    %c0_27 = arith.constant 0 : index
    %72 = vector.load %arg22[%c16, %c0_27] : memref<64x96xf32, #tpu.memory_space<vmem>>, vector<8x96xf32>
    %cst_28 = arith.constant dense<0.000000e+00> : vector<8x96xf32>
    %73 = tpu.matmul %70, %7, %cst_28 {dimension_numbers = #tpu.dot_dimension_numbers<[1], [0], [0], [1], [0, 0, 1, 1], [], []>} : vector<8x32xf32>, vector<32x96xf32>, vector<8x96xf32> -> vector<8x96xf32>
    %74 = arith.addf %73, %10 : vector<8x96xf32>
    %75 = vector.extract_strided_slice %72 {offsets = [0, 0], sizes = [8, 32], strides = [1, 1]} : vector<8x96xf32> to vector<8x32xf32>
    %76 = vector.extract_strided_slice %74 {offsets = [0, 0], sizes = [8, 32], strides = [1, 1]} : vector<8x96xf32> to vector<8x32xf32>
    %77 = arith.addf %75, %76 : vector<8x32xf32>
    %78 = arith.negf %77 : vector<8x32xf32>
    %79 = math.exp %78 : vector<8x32xf32>
    %cst_29 = arith.constant 1.000000e+00 : f32
    %80 = vector.broadcast %cst_29 : f32 to vector<8x32xf32>
    %81 = arith.addf %80, %79 : vector<8x32xf32>
    %82 = arith.divf %80, %81 : vector<8x32xf32>
    %83 = vector.extract_strided_slice %72 {offsets = [0, 32], sizes = [8, 32], strides = [1, 1]} : vector<8x96xf32> to vector<8x32xf32>
    %84 = vector.extract_strided_slice %74 {offsets = [0, 32], sizes = [8, 32], strides = [1, 1]} : vector<8x96xf32> to vector<8x32xf32>
    %85 = arith.addf %83, %84 : vector<8x32xf32>
    %86 = arith.negf %85 : vector<8x32xf32>
    %87 = math.exp %86 : vector<8x32xf32>
    %cst_30 = arith.constant 1.000000e+00 : f32
    %88 = vector.broadcast %cst_30 : f32 to vector<8x32xf32>
    %89 = arith.addf %88, %87 : vector<8x32xf32>
    %90 = arith.divf %88, %89 : vector<8x32xf32>
    %91 = vector.extract_strided_slice %72 {offsets = [0, 64], sizes = [8, 32], strides = [1, 1]} : vector<8x96xf32> to vector<8x32xf32>
    %92 = vector.extract_strided_slice %74 {offsets = [0, 64], sizes = [8, 32], strides = [1, 1]} : vector<8x96xf32> to vector<8x32xf32>
    %93 = arith.mulf %82, %92 : vector<8x32xf32>
    %94 = arith.addf %91, %93 : vector<8x32xf32>
    %95 = math.tanh %94 : vector<8x32xf32>
    %cst_31 = arith.constant 1.000000e+00 : f32
    %96 = vector.broadcast %cst_31 : f32 to vector<8x32xf32>
    %97 = arith.subf %96, %90 : vector<8x32xf32>
    %98 = arith.mulf %97, %95 : vector<8x32xf32>
    %99 = arith.mulf %90, %70 : vector<8x32xf32>
    %100 = arith.addf %98, %99 : vector<8x32xf32>
    %c16_32 = arith.constant 16 : index
    %c0_33 = arith.constant 0 : index
    %101 = vector.load %arg23[%c16_32, %c0_33] : memref<64x32xf32, #tpu.memory_space<vmem>>, vector<8x32xf32>
    tpu.vector_store %arg23[%c16_32, %c0_33], %100 {strides = array<i32>} : memref<64x32xf32, #tpu.memory_space<vmem>>, vector<8x32xf32>,
    %c24 = arith.constant 24 : index
    %c0_34 = arith.constant 0 : index
    %102 = vector.load %arg22[%c24, %c0_34] : memref<64x96xf32, #tpu.memory_space<vmem>>, vector<8x96xf32>
    %cst_35 = arith.constant dense<0.000000e+00> : vector<8x96xf32>
    %103 = tpu.matmul %100, %7, %cst_35 {dimension_numbers = #tpu.dot_dimension_numbers<[1], [0], [0], [1], [0, 0, 1, 1], [], []>} : vector<8x32xf32>, vector<32x96xf32>, vector<8x96xf32> -> vector<8x96xf32>
    %104 = arith.addf %103, %10 : vector<8x96xf32>
    %105 = vector.extract_strided_slice %102 {offsets = [0, 0], sizes = [8, 32], strides = [1, 1]} : vector<8x96xf32> to vector<8x32xf32>
    %106 = vector.extract_strided_slice %104 {offsets = [0, 0], sizes = [8, 32], strides = [1, 1]} : vector<8x96xf32> to vector<8x32xf32>
    %107 = arith.addf %105, %106 : vector<8x32xf32>
    %108 = arith.negf %107 : vector<8x32xf32>
    %109 = math.exp %108 : vector<8x32xf32>
    %cst_36 = arith.constant 1.000000e+00 : f32
    %110 = vector.broadcast %cst_36 : f32 to vector<8x32xf32>
    %111 = arith.addf %110, %109 : vector<8x32xf32>
    %112 = arith.divf %110, %111 : vector<8x32xf32>
    %113 = vector.extract_strided_slice %102 {offsets = [0, 32], sizes = [8, 32], strides = [1, 1]} : vector<8x96xf32> to vector<8x32xf32>
    %114 = vector.extract_strided_slice %104 {offsets = [0, 32], sizes = [8, 32], strides = [1, 1]} : vector<8x96xf32> to vector<8x32xf32>
    %115 = arith.addf %113, %114 : vector<8x32xf32>
    %116 = arith.negf %115 : vector<8x32xf32>
    %117 = math.exp %116 : vector<8x32xf32>
    %cst_37 = arith.constant 1.000000e+00 : f32
    %118 = vector.broadcast %cst_37 : f32 to vector<8x32xf32>
    %119 = arith.addf %118, %117 : vector<8x32xf32>
    %120 = arith.divf %118, %119 : vector<8x32xf32>
    %121 = vector.extract_strided_slice %102 {offsets = [0, 64], sizes = [8, 32], strides = [1, 1]} : vector<8x96xf32> to vector<8x32xf32>
    %122 = vector.extract_strided_slice %104 {offsets = [0, 64], sizes = [8, 32], strides = [1, 1]} : vector<8x96xf32> to vector<8x32xf32>
    %123 = arith.mulf %112, %122 : vector<8x32xf32>
    %124 = arith.addf %121, %123 : vector<8x32xf32>
    %125 = math.tanh %124 : vector<8x32xf32>
    %cst_38 = arith.constant 1.000000e+00 : f32
    %126 = vector.broadcast %cst_38 : f32 to vector<8x32xf32>
    %127 = arith.subf %126, %120 : vector<8x32xf32>
    %128 = arith.mulf %127, %125 : vector<8x32xf32>
    %129 = arith.mulf %120, %100 : vector<8x32xf32>
    %130 = arith.addf %128, %129 : vector<8x32xf32>
    %c24_39 = arith.constant 24 : index
    %c0_40 = arith.constant 0 : index
    %131 = vector.load %arg23[%c24_39, %c0_40] : memref<64x32xf32, #tpu.memory_space<vmem>>, vector<8x32xf32>
    tpu.vector_store %arg23[%c24_39, %c0_40], %130 {strides = array<i32>} : memref<64x32xf32, #tpu.memory_space<vmem>>, vector<8x32xf32>,
    %c32 = arith.constant 32 : index
    %c0_41 = arith.constant 0 : index
    %132 = vector.load %arg22[%c32, %c0_41] : memref<64x96xf32, #tpu.memory_space<vmem>>, vector<8x96xf32>
    %cst_42 = arith.constant dense<0.000000e+00> : vector<8x96xf32>
    %133 = tpu.matmul %130, %7, %cst_42 {dimension_numbers = #tpu.dot_dimension_numbers<[1], [0], [0], [1], [0, 0, 1, 1], [], []>} : vector<8x32xf32>, vector<32x96xf32>, vector<8x96xf32> -> vector<8x96xf32>
    %134 = arith.addf %133, %10 : vector<8x96xf32>
    %135 = vector.extract_strided_slice %132 {offsets = [0, 0], sizes = [8, 32], strides = [1, 1]} : vector<8x96xf32> to vector<8x32xf32>
    %136 = vector.extract_strided_slice %134 {offsets = [0, 0], sizes = [8, 32], strides = [1, 1]} : vector<8x96xf32> to vector<8x32xf32>
    %137 = arith.addf %135, %136 : vector<8x32xf32>
    %138 = arith.negf %137 : vector<8x32xf32>
    %139 = math.exp %138 : vector<8x32xf32>
    %cst_43 = arith.constant 1.000000e+00 : f32
    %140 = vector.broadcast %cst_43 : f32 to vector<8x32xf32>
    %141 = arith.addf %140, %139 : vector<8x32xf32>
    %142 = arith.divf %140, %141 : vector<8x32xf32>
    %143 = vector.extract_strided_slice %132 {offsets = [0, 32], sizes = [8, 32], strides = [1, 1]} : vector<8x96xf32> to vector<8x32xf32>
    %144 = vector.extract_strided_slice %134 {offsets = [0, 32], sizes = [8, 32], strides = [1, 1]} : vector<8x96xf32> to vector<8x32xf32>
    %145 = arith.addf %143, %144 : vector<8x32xf32>
    %146 = arith.negf %145 : vector<8x32xf32>
    %147 = math.exp %146 : vector<8x32xf32>
    %cst_44 = arith.constant 1.000000e+00 : f32
    %148 = vector.broadcast %cst_44 : f32 to vector<8x32xf32>
    %149 = arith.addf %148, %147 : vector<8x32xf32>
    %150 = arith.divf %148, %149 : vector<8x32xf32>
    %151 = vector.extract_strided_slice %132 {offsets = [0, 64], sizes = [8, 32], strides = [1, 1]} : vector<8x96xf32> to vector<8x32xf32>
    %152 = vector.extract_strided_slice %134 {offsets = [0, 64], sizes = [8, 32], strides = [1, 1]} : vector<8x96xf32> to vector<8x32xf32>
    %153 = arith.mulf %142, %152 : vector<8x32xf32>
    %154 = arith.addf %151, %153 : vector<8x32xf32>
    %155 = math.tanh %154 : vector<8x32xf32>
    %cst_45 = arith.constant 1.000000e+00 : f32
    %156 = vector.broadcast %cst_45 : f32 to vector<8x32xf32>
    %157 = arith.subf %156, %150 : vector<8x32xf32>
    %158 = arith.mulf %157, %155 : vector<8x32xf32>
    %159 = arith.mulf %150, %130 : vector<8x32xf32>
    %160 = arith.addf %158, %159 : vector<8x32xf32>
    %c32_46 = arith.constant 32 : index
    %c0_47 = arith.constant 0 : index
    %161 = vector.load %arg23[%c32_46, %c0_47] : memref<64x32xf32, #tpu.memory_space<vmem>>, vector<8x32xf32>
    tpu.vector_store %arg23[%c32_46, %c0_47], %160 {strides = array<i32>} : memref<64x32xf32, #tpu.memory_space<vmem>>, vector<8x32xf32>,
    %c40 = arith.constant 40 : index
    %c0_48 = arith.constant 0 : index
    %162 = vector.load %arg22[%c40, %c0_48] : memref<64x96xf32, #tpu.memory_space<vmem>>, vector<8x96xf32>
    %cst_49 = arith.constant dense<0.000000e+00> : vector<8x96xf32>
    %163 = tpu.matmul %160, %7, %cst_49 {dimension_numbers = #tpu.dot_dimension_numbers<[1], [0], [0], [1], [0, 0, 1, 1], [], []>} : vector<8x32xf32>, vector<32x96xf32>, vector<8x96xf32> -> vector<8x96xf32>
    %164 = arith.addf %163, %10 : vector<8x96xf32>
    %165 = vector.extract_strided_slice %162 {offsets = [0, 0], sizes = [8, 32], strides = [1, 1]} : vector<8x96xf32> to vector<8x32xf32>
    %166 = vector.extract_strided_slice %164 {offsets = [0, 0], sizes = [8, 32], strides = [1, 1]} : vector<8x96xf32> to vector<8x32xf32>
    %167 = arith.addf %165, %166 : vector<8x32xf32>
    %168 = arith.negf %167 : vector<8x32xf32>
    %169 = math.exp %168 : vector<8x32xf32>
    %cst_50 = arith.constant 1.000000e+00 : f32
    %170 = vector.broadcast %cst_50 : f32 to vector<8x32xf32>
    %171 = arith.addf %170, %169 : vector<8x32xf32>
    %172 = arith.divf %170, %171 : vector<8x32xf32>
    %173 = vector.extract_strided_slice %162 {offsets = [0, 32], sizes = [8, 32], strides = [1, 1]} : vector<8x96xf32> to vector<8x32xf32>
    %174 = vector.extract_strided_slice %164 {offsets = [0, 32], sizes = [8, 32], strides = [1, 1]} : vector<8x96xf32> to vector<8x32xf32>
    %175 = arith.addf %173, %174 : vector<8x32xf32>
    %176 = arith.negf %175 : vector<8x32xf32>
    %177 = math.exp %176 : vector<8x32xf32>
    %cst_51 = arith.constant 1.000000e+00 : f32
    %178 = vector.broadcast %cst_51 : f32 to vector<8x32xf32>
    %179 = arith.addf %178, %177 : vector<8x32xf32>
    %180 = arith.divf %178, %179 : vector<8x32xf32>
    %181 = vector.extract_strided_slice %162 {offsets = [0, 64], sizes = [8, 32], strides = [1, 1]} : vector<8x96xf32> to vector<8x32xf32>
    %182 = vector.extract_strided_slice %164 {offsets = [0, 64], sizes = [8, 32], strides = [1, 1]} : vector<8x96xf32> to vector<8x32xf32>
    %183 = arith.mulf %172, %182 : vector<8x32xf32>
    %184 = arith.addf %181, %183 : vector<8x32xf32>
    %185 = math.tanh %184 : vector<8x32xf32>
    %cst_52 = arith.constant 1.000000e+00 : f32
    %186 = vector.broadcast %cst_52 : f32 to vector<8x32xf32>
    %187 = arith.subf %186, %180 : vector<8x32xf32>
    %188 = arith.mulf %187, %185 : vector<8x32xf32>
    %189 = arith.mulf %180, %160 : vector<8x32xf32>
    %190 = arith.addf %188, %189 : vector<8x32xf32>
    %c40_53 = arith.constant 40 : index
    %c0_54 = arith.constant 0 : index
    %191 = vector.load %arg23[%c40_53, %c0_54] : memref<64x32xf32, #tpu.memory_space<vmem>>, vector<8x32xf32>
    tpu.vector_store %arg23[%c40_53, %c0_54], %190 {strides = array<i32>} : memref<64x32xf32, #tpu.memory_space<vmem>>, vector<8x32xf32>,
    %c48 = arith.constant 48 : index
    %c0_55 = arith.constant 0 : index
    %192 = vector.load %arg22[%c48, %c0_55] : memref<64x96xf32, #tpu.memory_space<vmem>>, vector<8x96xf32>
    %cst_56 = arith.constant dense<0.000000e+00> : vector<8x96xf32>
    %193 = tpu.matmul %190, %7, %cst_56 {dimension_numbers = #tpu.dot_dimension_numbers<[1], [0], [0], [1], [0, 0, 1, 1], [], []>} : vector<8x32xf32>, vector<32x96xf32>, vector<8x96xf32> -> vector<8x96xf32>
    %194 = arith.addf %193, %10 : vector<8x96xf32>
    %195 = vector.extract_strided_slice %192 {offsets = [0, 0], sizes = [8, 32], strides = [1, 1]} : vector<8x96xf32> to vector<8x32xf32>
    %196 = vector.extract_strided_slice %194 {offsets = [0, 0], sizes = [8, 32], strides = [1, 1]} : vector<8x96xf32> to vector<8x32xf32>
    %197 = arith.addf %195, %196 : vector<8x32xf32>
    %198 = arith.negf %197 : vector<8x32xf32>
    %199 = math.exp %198 : vector<8x32xf32>
    %cst_57 = arith.constant 1.000000e+00 : f32
    %200 = vector.broadcast %cst_57 : f32 to vector<8x32xf32>
    %201 = arith.addf %200, %199 : vector<8x32xf32>
    %202 = arith.divf %200, %201 : vector<8x32xf32>
    %203 = vector.extract_strided_slice %192 {offsets = [0, 32], sizes = [8, 32], strides = [1, 1]} : vector<8x96xf32> to vector<8x32xf32>
    %204 = vector.extract_strided_slice %194 {offsets = [0, 32], sizes = [8, 32], strides = [1, 1]} : vector<8x96xf32> to vector<8x32xf32>
    %205 = arith.addf %203, %204 : vector<8x32xf32>
    %206 = arith.negf %205 : vector<8x32xf32>
    %207 = math.exp %206 : vector<8x32xf32>
    %cst_58 = arith.constant 1.000000e+00 : f32
    %208 = vector.broadcast %cst_58 : f32 to vector<8x32xf32>
    %209 = arith.addf %208, %207 : vector<8x32xf32>
    %210 = arith.divf %208, %209 : vector<8x32xf32>
    %211 = vector.extract_strided_slice %192 {offsets = [0, 64], sizes = [8, 32], strides = [1, 1]} : vector<8x96xf32> to vector<8x32xf32>
    %212 = vector.extract_strided_slice %194 {offsets = [0, 64], sizes = [8, 32], strides = [1, 1]} : vector<8x96xf32> to vector<8x32xf32>
    %213 = arith.mulf %202, %212 : vector<8x32xf32>
    %214 = arith.addf %211, %213 : vector<8x32xf32>
    %215 = math.tanh %214 : vector<8x32xf32>
    %cst_59 = arith.constant 1.000000e+00 : f32
    %216 = vector.broadcast %cst_59 : f32 to vector<8x32xf32>
    %217 = arith.subf %216, %210 : vector<8x32xf32>
    %218 = arith.mulf %217, %215 : vector<8x32xf32>
    %219 = arith.mulf %210, %190 : vector<8x32xf32>
    %220 = arith.addf %218, %219 : vector<8x32xf32>
    %c48_60 = arith.constant 48 : index
    %c0_61 = arith.constant 0 : index
    %221 = vector.load %arg23[%c48_60, %c0_61] : memref<64x32xf32, #tpu.memory_space<vmem>>, vector<8x32xf32>
    tpu.vector_store %arg23[%c48_60, %c0_61], %220 {strides = array<i32>} : memref<64x32xf32, #tpu.memory_space<vmem>>, vector<8x32xf32>,
    %c56 = arith.constant 56 : index
    %c0_62 = arith.constant 0 : index
    %222 = vector.load %arg22[%c56, %c0_62] : memref<64x96xf32, #tpu.memory_space<vmem>>, vector<8x96xf32>
    %cst_63 = arith.constant dense<0.000000e+00> : vector<8x96xf32>
    %223 = tpu.matmul %220, %7, %cst_63 {dimension_numbers = #tpu.dot_dimension_numbers<[1], [0], [0], [1], [0, 0, 1, 1], [], []>} : vector<8x32xf32>, vector<32x96xf32>, vector<8x96xf32> -> vector<8x96xf32>
    %224 = arith.addf %223, %10 : vector<8x96xf32>
    %225 = vector.extract_strided_slice %222 {offsets = [0, 0], sizes = [8, 32], strides = [1, 1]} : vector<8x96xf32> to vector<8x32xf32>
    %226 = vector.extract_strided_slice %224 {offsets = [0, 0], sizes = [8, 32], strides = [1, 1]} : vector<8x96xf32> to vector<8x32xf32>
    %227 = arith.addf %225, %226 : vector<8x32xf32>
    %228 = arith.negf %227 : vector<8x32xf32>
    %229 = math.exp %228 : vector<8x32xf32>
    %cst_64 = arith.constant 1.000000e+00 : f32
    %230 = vector.broadcast %cst_64 : f32 to vector<8x32xf32>
    %231 = arith.addf %230, %229 : vector<8x32xf32>
    %232 = arith.divf %230, %231 : vector<8x32xf32>
    %233 = vector.extract_strided_slice %222 {offsets = [0, 32], sizes = [8, 32], strides = [1, 1]} : vector<8x96xf32> to vector<8x32xf32>
    %234 = vector.extract_strided_slice %224 {offsets = [0, 32], sizes = [8, 32], strides = [1, 1]} : vector<8x96xf32> to vector<8x32xf32>
    %235 = arith.addf %233, %234 : vector<8x32xf32>
    %236 = arith.negf %235 : vector<8x32xf32>
    %237 = math.exp %236 : vector<8x32xf32>
    %cst_65 = arith.constant 1.000000e+00 : f32
    %238 = vector.broadcast %cst_65 : f32 to vector<8x32xf32>
    %239 = arith.addf %238, %237 : vector<8x32xf32>
    %240 = arith.divf %238, %239 : vector<8x32xf32>
    %241 = vector.extract_strided_slice %222 {offsets = [0, 64], sizes = [8, 32], strides = [1, 1]} : vector<8x96xf32> to vector<8x32xf32>
    %242 = vector.extract_strided_slice %224 {offsets = [0, 64], sizes = [8, 32], strides = [1, 1]} : vector<8x96xf32> to vector<8x32xf32>
    %243 = arith.mulf %232, %242 : vector<8x32xf32>
    %244 = arith.addf %241, %243 : vector<8x32xf32>
    %245 = math.tanh %244 : vector<8x32xf32>
    %cst_66 = arith.constant 1.000000e+00 : f32
    %246 = vector.broadcast %cst_66 : f32 to vector<8x32xf32>
    %247 = arith.subf %246, %240 : vector<8x32xf32>
    %248 = arith.mulf %247, %245 : vector<8x32xf32>
    %249 = arith.mulf %240, %220 : vector<8x32xf32>
    %250 = arith.addf %248, %249 : vector<8x32xf32>
    %c56_67 = arith.constant 56 : index
    %c0_68 = arith.constant 0 : index
    %251 = vector.load %arg23[%c56_67, %c0_68] : memref<64x32xf32, #tpu.memory_space<vmem>>, vector<8x32xf32>
    tpu.vector_store %arg23[%c56_67, %c0_68], %250 {strides = array<i32>} : memref<64x32xf32, #tpu.memory_space<vmem>>, vector<8x32xf32>,
    %c0_69 = arith.constant 0 : index
    %c0_70 = arith.constant 0 : index
    %252 = vector.load %arg23[%c0_69, %c0_70] : memref<64x32xf32, #tpu.memory_space<vmem>>, vector<64x32xf32>
    %c0_71 = arith.constant 0 : index
    %c0_72 = arith.constant 0 : index
    %253 = vector.load %arg6[%c0_71, %c0_72] : memref<32x96xf32, #tpu.memory_space<vmem>>, vector<32x96xf32>
    %cst_73 = arith.constant dense<0.000000e+00> : vector<64x96xf32>
    %254 = tpu.matmul %252, %253, %cst_73 {dimension_numbers = #tpu.dot_dimension_numbers<[1], [0], [0], [1], [0, 0, 1, 1], [], []>} : vector<64x32xf32>, vector<32x96xf32>, vector<64x96xf32> -> vector<64x96xf32>
    %c0_74 = arith.constant 0 : index
    %c0_75 = arith.constant 0 : index
    %255 = vector.load %arg8[%c0_74, %c0_75] : memref<1x96xf32, #tpu.memory_space<vmem>>, vector<1x96xf32>
    %256 = vector.broadcast %255 : vector<1x96xf32> to vector<64x96xf32>
    %257 = arith.addf %254, %256 : vector<64x96xf32>
    %c0_76 = arith.constant 0 : index
    %c0_77 = arith.constant 0 : index
    %258 = vector.load %arg22[%c0_76, %c0_77] : memref<64x96xf32, #tpu.memory_space<vmem>>, vector<64x96xf32>
    tpu.vector_store %arg22[%c0_76, %c0_77], %257 {strides = array<i32>} : memref<64x96xf32, #tpu.memory_space<vmem>>, vector<64x96xf32>,
    %c0_78 = arith.constant 0 : index
    %c0_79 = arith.constant 0 : index
    %259 = vector.load %arg7[%c0_78, %c0_79] : memref<32x96xf32, #tpu.memory_space<vmem>>, vector<32x96xf32>
    %c0_80 = arith.constant 0 : index
    %c0_81 = arith.constant 0 : index
    %260 = vector.load %arg9[%c0_80, %c0_81] : memref<1x96xf32, #tpu.memory_space<vmem>>, vector<1x96xf32>
    %261 = vector.shape_cast %260 : vector<1x96xf32> to vector<1x96xf32>
    %262 = vector.broadcast %261 : vector<1x96xf32> to vector<8x96xf32>
    %cst_82 = arith.constant 0.000000e+00 : f32
    %263 = vector.broadcast %cst_82 : f32 to vector<8x32xf32>
    %c0_83 = arith.constant 0 : index
    %c0_84 = arith.constant 0 : index
    %264 = vector.load %arg22[%c0_83, %c0_84] : memref<64x96xf32, #tpu.memory_space<vmem>>, vector<8x96xf32>
    %cst_85 = arith.constant dense<0.000000e+00> : vector<8x96xf32>
    %265 = tpu.matmul %263, %259, %cst_85 {dimension_numbers = #tpu.dot_dimension_numbers<[1], [0], [0], [1], [0, 0, 1, 1], [], []>} : vector<8x32xf32>, vector<32x96xf32>, vector<8x96xf32> -> vector<8x96xf32>
    %266 = arith.addf %265, %262 : vector<8x96xf32>
    %267 = vector.extract_strided_slice %264 {offsets = [0, 0], sizes = [8, 32], strides = [1, 1]} : vector<8x96xf32> to vector<8x32xf32>
    %268 = vector.extract_strided_slice %266 {offsets = [0, 0], sizes = [8, 32], strides = [1, 1]} : vector<8x96xf32> to vector<8x32xf32>
    %269 = arith.addf %267, %268 : vector<8x32xf32>
    %270 = arith.negf %269 : vector<8x32xf32>
    %271 = math.exp %270 : vector<8x32xf32>
    %cst_86 = arith.constant 1.000000e+00 : f32
    %272 = vector.broadcast %cst_86 : f32 to vector<8x32xf32>
    %273 = arith.addf %272, %271 : vector<8x32xf32>
    %274 = arith.divf %272, %273 : vector<8x32xf32>
    %275 = vector.extract_strided_slice %264 {offsets = [0, 32], sizes = [8, 32], strides = [1, 1]} : vector<8x96xf32> to vector<8x32xf32>
    %276 = vector.extract_strided_slice %266 {offsets = [0, 32], sizes = [8, 32], strides = [1, 1]} : vector<8x96xf32> to vector<8x32xf32>
    %277 = arith.addf %275, %276 : vector<8x32xf32>
    %278 = arith.negf %277 : vector<8x32xf32>
    %279 = math.exp %278 : vector<8x32xf32>
    %cst_87 = arith.constant 1.000000e+00 : f32
    %280 = vector.broadcast %cst_87 : f32 to vector<8x32xf32>
    %281 = arith.addf %280, %279 : vector<8x32xf32>
    %282 = arith.divf %280, %281 : vector<8x32xf32>
    %283 = vector.extract_strided_slice %264 {offsets = [0, 64], sizes = [8, 32], strides = [1, 1]} : vector<8x96xf32> to vector<8x32xf32>
    %284 = vector.extract_strided_slice %266 {offsets = [0, 64], sizes = [8, 32], strides = [1, 1]} : vector<8x96xf32> to vector<8x32xf32>
    %285 = arith.mulf %274, %284 : vector<8x32xf32>
    %286 = arith.addf %283, %285 : vector<8x32xf32>
    %287 = math.tanh %286 : vector<8x32xf32>
    %cst_88 = arith.constant 1.000000e+00 : f32
    %288 = vector.broadcast %cst_88 : f32 to vector<8x32xf32>
    %289 = arith.subf %288, %282 : vector<8x32xf32>
    %290 = arith.mulf %289, %287 : vector<8x32xf32>
    %291 = arith.mulf %282, %263 : vector<8x32xf32>
    %292 = arith.addf %290, %291 : vector<8x32xf32>
    %c8_89 = arith.constant 8 : index
    %c0_90 = arith.constant 0 : index
    %293 = vector.load %arg22[%c8_89, %c0_90] : memref<64x96xf32, #tpu.memory_space<vmem>>, vector<8x96xf32>
    %cst_91 = arith.constant dense<0.000000e+00> : vector<8x96xf32>
    %294 = tpu.matmul %292, %259, %cst_91 {dimension_numbers = #tpu.dot_dimension_numbers<[1], [0], [0], [1], [0, 0, 1, 1], [], []>} : vector<8x32xf32>, vector<32x96xf32>, vector<8x96xf32> -> vector<8x96xf32>
    %295 = arith.addf %294, %262 : vector<8x96xf32>
    %296 = vector.extract_strided_slice %293 {offsets = [0, 0], sizes = [8, 32], strides = [1, 1]} : vector<8x96xf32> to vector<8x32xf32>
    %297 = vector.extract_strided_slice %295 {offsets = [0, 0], sizes = [8, 32], strides = [1, 1]} : vector<8x96xf32> to vector<8x32xf32>
    %298 = arith.addf %296, %297 : vector<8x32xf32>
    %299 = arith.negf %298 : vector<8x32xf32>
    %300 = math.exp %299 : vector<8x32xf32>
    %cst_92 = arith.constant 1.000000e+00 : f32
    %301 = vector.broadcast %cst_92 : f32 to vector<8x32xf32>
    %302 = arith.addf %301, %300 : vector<8x32xf32>
    %303 = arith.divf %301, %302 : vector<8x32xf32>
    %304 = vector.extract_strided_slice %293 {offsets = [0, 32], sizes = [8, 32], strides = [1, 1]} : vector<8x96xf32> to vector<8x32xf32>
    %305 = vector.extract_strided_slice %295 {offsets = [0, 32], sizes = [8, 32], strides = [1, 1]} : vector<8x96xf32> to vector<8x32xf32>
    %306 = arith.addf %304, %305 : vector<8x32xf32>
    %307 = arith.negf %306 : vector<8x32xf32>
    %308 = math.exp %307 : vector<8x32xf32>
    %cst_93 = arith.constant 1.000000e+00 : f32
    %309 = vector.broadcast %cst_93 : f32 to vector<8x32xf32>
    %310 = arith.addf %309, %308 : vector<8x32xf32>
    %311 = arith.divf %309, %310 : vector<8x32xf32>
    %312 = vector.extract_strided_slice %293 {offsets = [0, 64], sizes = [8, 32], strides = [1, 1]} : vector<8x96xf32> to vector<8x32xf32>
    %313 = vector.extract_strided_slice %295 {offsets = [0, 64], sizes = [8, 32], strides = [1, 1]} : vector<8x96xf32> to vector<8x32xf32>
    %314 = arith.mulf %303, %313 : vector<8x32xf32>
    %315 = arith.addf %312, %314 : vector<8x32xf32>
    %316 = math.tanh %315 : vector<8x32xf32>
    %cst_94 = arith.constant 1.000000e+00 : f32
    %317 = vector.broadcast %cst_94 : f32 to vector<8x32xf32>
    %318 = arith.subf %317, %311 : vector<8x32xf32>
    %319 = arith.mulf %318, %316 : vector<8x32xf32>
    %320 = arith.mulf %311, %292 : vector<8x32xf32>
    %321 = arith.addf %319, %320 : vector<8x32xf32>
    %c16_95 = arith.constant 16 : index
    %c0_96 = arith.constant 0 : index
    %322 = vector.load %arg22[%c16_95, %c0_96] : memref<64x96xf32, #tpu.memory_space<vmem>>, vector<8x96xf32>
    %cst_97 = arith.constant dense<0.000000e+00> : vector<8x96xf32>
    %323 = tpu.matmul %321, %259, %cst_97 {dimension_numbers = #tpu.dot_dimension_numbers<[1], [0], [0], [1], [0, 0, 1, 1], [], []>} : vector<8x32xf32>, vector<32x96xf32>, vector<8x96xf32> -> vector<8x96xf32>
    %324 = arith.addf %323, %262 : vector<8x96xf32>
    %325 = vector.extract_strided_slice %322 {offsets = [0, 0], sizes = [8, 32], strides = [1, 1]} : vector<8x96xf32> to vector<8x32xf32>
    %326 = vector.extract_strided_slice %324 {offsets = [0, 0], sizes = [8, 32], strides = [1, 1]} : vector<8x96xf32> to vector<8x32xf32>
    %327 = arith.addf %325, %326 : vector<8x32xf32>
    %328 = arith.negf %327 : vector<8x32xf32>
    %329 = math.exp %328 : vector<8x32xf32>
    %cst_98 = arith.constant 1.000000e+00 : f32
    %330 = vector.broadcast %cst_98 : f32 to vector<8x32xf32>
    %331 = arith.addf %330, %329 : vector<8x32xf32>
    %332 = arith.divf %330, %331 : vector<8x32xf32>
    %333 = vector.extract_strided_slice %322 {offsets = [0, 32], sizes = [8, 32], strides = [1, 1]} : vector<8x96xf32> to vector<8x32xf32>
    %334 = vector.extract_strided_slice %324 {offsets = [0, 32], sizes = [8, 32], strides = [1, 1]} : vector<8x96xf32> to vector<8x32xf32>
    %335 = arith.addf %333, %334 : vector<8x32xf32>
    %336 = arith.negf %335 : vector<8x32xf32>
    %337 = math.exp %336 : vector<8x32xf32>
    %cst_99 = arith.constant 1.000000e+00 : f32
    %338 = vector.broadcast %cst_99 : f32 to vector<8x32xf32>
    %339 = arith.addf %338, %337 : vector<8x32xf32>
    %340 = arith.divf %338, %339 : vector<8x32xf32>
    %341 = vector.extract_strided_slice %322 {offsets = [0, 64], sizes = [8, 32], strides = [1, 1]} : vector<8x96xf32> to vector<8x32xf32>
    %342 = vector.extract_strided_slice %324 {offsets = [0, 64], sizes = [8, 32], strides = [1, 1]} : vector<8x96xf32> to vector<8x32xf32>
    %343 = arith.mulf %332, %342 : vector<8x32xf32>
    %344 = arith.addf %341, %343 : vector<8x32xf32>
    %345 = math.tanh %344 : vector<8x32xf32>
    %cst_100 = arith.constant 1.000000e+00 : f32
    %346 = vector.broadcast %cst_100 : f32 to vector<8x32xf32>
    %347 = arith.subf %346, %340 : vector<8x32xf32>
    %348 = arith.mulf %347, %345 : vector<8x32xf32>
    %349 = arith.mulf %340, %321 : vector<8x32xf32>
    %350 = arith.addf %348, %349 : vector<8x32xf32>
    %c24_101 = arith.constant 24 : index
    %c0_102 = arith.constant 0 : index
    %351 = vector.load %arg22[%c24_101, %c0_102] : memref<64x96xf32, #tpu.memory_space<vmem>>, vector<8x96xf32>
    %cst_103 = arith.constant dense<0.000000e+00> : vector<8x96xf32>
    %352 = tpu.matmul %350, %259, %cst_103 {dimension_numbers = #tpu.dot_dimension_numbers<[1], [0], [0], [1], [0, 0, 1, 1], [], []>} : vector<8x32xf32>, vector<32x96xf32>, vector<8x96xf32> -> vector<8x96xf32>
    %353 = arith.addf %352, %262 : vector<8x96xf32>
    %354 = vector.extract_strided_slice %351 {offsets = [0, 0], sizes = [8, 32], strides = [1, 1]} : vector<8x96xf32> to vector<8x32xf32>
    %355 = vector.extract_strided_slice %353 {offsets = [0, 0], sizes = [8, 32], strides = [1, 1]} : vector<8x96xf32> to vector<8x32xf32>
    %356 = arith.addf %354, %355 : vector<8x32xf32>
    %357 = arith.negf %356 : vector<8x32xf32>
    %358 = math.exp %357 : vector<8x32xf32>
    %cst_104 = arith.constant 1.000000e+00 : f32
    %359 = vector.broadcast %cst_104 : f32 to vector<8x32xf32>
    %360 = arith.addf %359, %358 : vector<8x32xf32>
    %361 = arith.divf %359, %360 : vector<8x32xf32>
    %362 = vector.extract_strided_slice %351 {offsets = [0, 32], sizes = [8, 32], strides = [1, 1]} : vector<8x96xf32> to vector<8x32xf32>
    %363 = vector.extract_strided_slice %353 {offsets = [0, 32], sizes = [8, 32], strides = [1, 1]} : vector<8x96xf32> to vector<8x32xf32>
    %364 = arith.addf %362, %363 : vector<8x32xf32>
    %365 = arith.negf %364 : vector<8x32xf32>
    %366 = math.exp %365 : vector<8x32xf32>
    %cst_105 = arith.constant 1.000000e+00 : f32
    %367 = vector.broadcast %cst_105 : f32 to vector<8x32xf32>
    %368 = arith.addf %367, %366 : vector<8x32xf32>
    %369 = arith.divf %367, %368 : vector<8x32xf32>
    %370 = vector.extract_strided_slice %351 {offsets = [0, 64], sizes = [8, 32], strides = [1, 1]} : vector<8x96xf32> to vector<8x32xf32>
    %371 = vector.extract_strided_slice %353 {offsets = [0, 64], sizes = [8, 32], strides = [1, 1]} : vector<8x96xf32> to vector<8x32xf32>
    %372 = arith.mulf %361, %371 : vector<8x32xf32>
    %373 = arith.addf %370, %372 : vector<8x32xf32>
    %374 = math.tanh %373 : vector<8x32xf32>
    %cst_106 = arith.constant 1.000000e+00 : f32
    %375 = vector.broadcast %cst_106 : f32 to vector<8x32xf32>
    %376 = arith.subf %375, %369 : vector<8x32xf32>
    %377 = arith.mulf %376, %374 : vector<8x32xf32>
    %378 = arith.mulf %369, %350 : vector<8x32xf32>
    %379 = arith.addf %377, %378 : vector<8x32xf32>
    %c32_107 = arith.constant 32 : index
    %c0_108 = arith.constant 0 : index
    %380 = vector.load %arg22[%c32_107, %c0_108] : memref<64x96xf32, #tpu.memory_space<vmem>>, vector<8x96xf32>
    %cst_109 = arith.constant dense<0.000000e+00> : vector<8x96xf32>
    %381 = tpu.matmul %379, %259, %cst_109 {dimension_numbers = #tpu.dot_dimension_numbers<[1], [0], [0], [1], [0, 0, 1, 1], [], []>} : vector<8x32xf32>, vector<32x96xf32>, vector<8x96xf32> -> vector<8x96xf32>
    %382 = arith.addf %381, %262 : vector<8x96xf32>
    %383 = vector.extract_strided_slice %380 {offsets = [0, 0], sizes = [8, 32], strides = [1, 1]} : vector<8x96xf32> to vector<8x32xf32>
    %384 = vector.extract_strided_slice %382 {offsets = [0, 0], sizes = [8, 32], strides = [1, 1]} : vector<8x96xf32> to vector<8x32xf32>
    %385 = arith.addf %383, %384 : vector<8x32xf32>
    %386 = arith.negf %385 : vector<8x32xf32>
    %387 = math.exp %386 : vector<8x32xf32>
    %cst_110 = arith.constant 1.000000e+00 : f32
    %388 = vector.broadcast %cst_110 : f32 to vector<8x32xf32>
    %389 = arith.addf %388, %387 : vector<8x32xf32>
    %390 = arith.divf %388, %389 : vector<8x32xf32>
    %391 = vector.extract_strided_slice %380 {offsets = [0, 32], sizes = [8, 32], strides = [1, 1]} : vector<8x96xf32> to vector<8x32xf32>
    %392 = vector.extract_strided_slice %382 {offsets = [0, 32], sizes = [8, 32], strides = [1, 1]} : vector<8x96xf32> to vector<8x32xf32>
    %393 = arith.addf %391, %392 : vector<8x32xf32>
    %394 = arith.negf %393 : vector<8x32xf32>
    %395 = math.exp %394 : vector<8x32xf32>
    %cst_111 = arith.constant 1.000000e+00 : f32
    %396 = vector.broadcast %cst_111 : f32 to vector<8x32xf32>
    %397 = arith.addf %396, %395 : vector<8x32xf32>
    %398 = arith.divf %396, %397 : vector<8x32xf32>
    %399 = vector.extract_strided_slice %380 {offsets = [0, 64], sizes = [8, 32], strides = [1, 1]} : vector<8x96xf32> to vector<8x32xf32>
    %400 = vector.extract_strided_slice %382 {offsets = [0, 64], sizes = [8, 32], strides = [1, 1]} : vector<8x96xf32> to vector<8x32xf32>
    %401 = arith.mulf %390, %400 : vector<8x32xf32>
    %402 = arith.addf %399, %401 : vector<8x32xf32>
    %403 = math.tanh %402 : vector<8x32xf32>
    %cst_112 = arith.constant 1.000000e+00 : f32
    %404 = vector.broadcast %cst_112 : f32 to vector<8x32xf32>
    %405 = arith.subf %404, %398 : vector<8x32xf32>
    %406 = arith.mulf %405, %403 : vector<8x32xf32>
    %407 = arith.mulf %398, %379 : vector<8x32xf32>
    %408 = arith.addf %406, %407 : vector<8x32xf32>
    %c40_113 = arith.constant 40 : index
    %c0_114 = arith.constant 0 : index
    %409 = vector.load %arg22[%c40_113, %c0_114] : memref<64x96xf32, #tpu.memory_space<vmem>>, vector<8x96xf32>
    %cst_115 = arith.constant dense<0.000000e+00> : vector<8x96xf32>
    %410 = tpu.matmul %408, %259, %cst_115 {dimension_numbers = #tpu.dot_dimension_numbers<[1], [0], [0], [1], [0, 0, 1, 1], [], []>} : vector<8x32xf32>, vector<32x96xf32>, vector<8x96xf32> -> vector<8x96xf32>
    %411 = arith.addf %410, %262 : vector<8x96xf32>
    %412 = vector.extract_strided_slice %409 {offsets = [0, 0], sizes = [8, 32], strides = [1, 1]} : vector<8x96xf32> to vector<8x32xf32>
    %413 = vector.extract_strided_slice %411 {offsets = [0, 0], sizes = [8, 32], strides = [1, 1]} : vector<8x96xf32> to vector<8x32xf32>
    %414 = arith.addf %412, %413 : vector<8x32xf32>
    %415 = arith.negf %414 : vector<8x32xf32>
    %416 = math.exp %415 : vector<8x32xf32>
    %cst_116 = arith.constant 1.000000e+00 : f32
    %417 = vector.broadcast %cst_116 : f32 to vector<8x32xf32>
    %418 = arith.addf %417, %416 : vector<8x32xf32>
    %419 = arith.divf %417, %418 : vector<8x32xf32>
    %420 = vector.extract_strided_slice %409 {offsets = [0, 32], sizes = [8, 32], strides = [1, 1]} : vector<8x96xf32> to vector<8x32xf32>
    %421 = vector.extract_strided_slice %411 {offsets = [0, 32], sizes = [8, 32], strides = [1, 1]} : vector<8x96xf32> to vector<8x32xf32>
    %422 = arith.addf %420, %421 : vector<8x32xf32>
    %423 = arith.negf %422 : vector<8x32xf32>
    %424 = math.exp %423 : vector<8x32xf32>
    %cst_117 = arith.constant 1.000000e+00 : f32
    %425 = vector.broadcast %cst_117 : f32 to vector<8x32xf32>
    %426 = arith.addf %425, %424 : vector<8x32xf32>
    %427 = arith.divf %425, %426 : vector<8x32xf32>
    %428 = vector.extract_strided_slice %409 {offsets = [0, 64], sizes = [8, 32], strides = [1, 1]} : vector<8x96xf32> to vector<8x32xf32>
    %429 = vector.extract_strided_slice %411 {offsets = [0, 64], sizes = [8, 32], strides = [1, 1]} : vector<8x96xf32> to vector<8x32xf32>
    %430 = arith.mulf %419, %429 : vector<8x32xf32>
    %431 = arith.addf %428, %430 : vector<8x32xf32>
    %432 = math.tanh %431 : vector<8x32xf32>
    %cst_118 = arith.constant 1.000000e+00 : f32
    %433 = vector.broadcast %cst_118 : f32 to vector<8x32xf32>
    %434 = arith.subf %433, %427 : vector<8x32xf32>
    %435 = arith.mulf %434, %432 : vector<8x32xf32>
    %436 = arith.mulf %427, %408 : vector<8x32xf32>
    %437 = arith.addf %435, %436 : vector<8x32xf32>
    %c48_119 = arith.constant 48 : index
    %c0_120 = arith.constant 0 : index
    %438 = vector.load %arg22[%c48_119, %c0_120] : memref<64x96xf32, #tpu.memory_space<vmem>>, vector<8x96xf32>
    %cst_121 = arith.constant dense<0.000000e+00> : vector<8x96xf32>
    %439 = tpu.matmul %437, %259, %cst_121 {dimension_numbers = #tpu.dot_dimension_numbers<[1], [0], [0], [1], [0, 0, 1, 1], [], []>} : vector<8x32xf32>, vector<32x96xf32>, vector<8x96xf32> -> vector<8x96xf32>
    %440 = arith.addf %439, %262 : vector<8x96xf32>
    %441 = vector.extract_strided_slice %438 {offsets = [0, 0], sizes = [8, 32], strides = [1, 1]} : vector<8x96xf32> to vector<8x32xf32>
    %442 = vector.extract_strided_slice %440 {offsets = [0, 0], sizes = [8, 32], strides = [1, 1]} : vector<8x96xf32> to vector<8x32xf32>
    %443 = arith.addf %441, %442 : vector<8x32xf32>
    %444 = arith.negf %443 : vector<8x32xf32>
    %445 = math.exp %444 : vector<8x32xf32>
    %cst_122 = arith.constant 1.000000e+00 : f32
    %446 = vector.broadcast %cst_122 : f32 to vector<8x32xf32>
    %447 = arith.addf %446, %445 : vector<8x32xf32>
    %448 = arith.divf %446, %447 : vector<8x32xf32>
    %449 = vector.extract_strided_slice %438 {offsets = [0, 32], sizes = [8, 32], strides = [1, 1]} : vector<8x96xf32> to vector<8x32xf32>
    %450 = vector.extract_strided_slice %440 {offsets = [0, 32], sizes = [8, 32], strides = [1, 1]} : vector<8x96xf32> to vector<8x32xf32>
    %451 = arith.addf %449, %450 : vector<8x32xf32>
    %452 = arith.negf %451 : vector<8x32xf32>
    %453 = math.exp %452 : vector<8x32xf32>
    %cst_123 = arith.constant 1.000000e+00 : f32
    %454 = vector.broadcast %cst_123 : f32 to vector<8x32xf32>
    %455 = arith.addf %454, %453 : vector<8x32xf32>
    %456 = arith.divf %454, %455 : vector<8x32xf32>
    %457 = vector.extract_strided_slice %438 {offsets = [0, 64], sizes = [8, 32], strides = [1, 1]} : vector<8x96xf32> to vector<8x32xf32>
    %458 = vector.extract_strided_slice %440 {offsets = [0, 64], sizes = [8, 32], strides = [1, 1]} : vector<8x96xf32> to vector<8x32xf32>
    %459 = arith.mulf %448, %458 : vector<8x32xf32>
    %460 = arith.addf %457, %459 : vector<8x32xf32>
    %461 = math.tanh %460 : vector<8x32xf32>
    %cst_124 = arith.constant 1.000000e+00 : f32
    %462 = vector.broadcast %cst_124 : f32 to vector<8x32xf32>
    %463 = arith.subf %462, %456 : vector<8x32xf32>
    %464 = arith.mulf %463, %461 : vector<8x32xf32>
    %465 = arith.mulf %456, %437 : vector<8x32xf32>
    %466 = arith.addf %464, %465 : vector<8x32xf32>
    %c56_125 = arith.constant 56 : index
    %c0_126 = arith.constant 0 : index
    %467 = vector.load %arg22[%c56_125, %c0_126] : memref<64x96xf32, #tpu.memory_space<vmem>>, vector<8x96xf32>
    %cst_127 = arith.constant dense<0.000000e+00> : vector<8x96xf32>
    %468 = tpu.matmul %466, %259, %cst_127 {dimension_numbers = #tpu.dot_dimension_numbers<[1], [0], [0], [1], [0, 0, 1, 1], [], []>} : vector<8x32xf32>, vector<32x96xf32>, vector<8x96xf32> -> vector<8x96xf32>
    %469 = arith.addf %468, %262 : vector<8x96xf32>
    %470 = vector.extract_strided_slice %467 {offsets = [0, 0], sizes = [8, 32], strides = [1, 1]} : vector<8x96xf32> to vector<8x32xf32>
    %471 = vector.extract_strided_slice %469 {offsets = [0, 0], sizes = [8, 32], strides = [1, 1]} : vector<8x96xf32> to vector<8x32xf32>
    %472 = arith.addf %470, %471 : vector<8x32xf32>
    %473 = arith.negf %472 : vector<8x32xf32>
    %474 = math.exp %473 : vector<8x32xf32>
    %cst_128 = arith.constant 1.000000e+00 : f32
    %475 = vector.broadcast %cst_128 : f32 to vector<8x32xf32>
    %476 = arith.addf %475, %474 : vector<8x32xf32>
    %477 = arith.divf %475, %476 : vector<8x32xf32>
    %478 = vector.extract_strided_slice %467 {offsets = [0, 32], sizes = [8, 32], strides = [1, 1]} : vector<8x96xf32> to vector<8x32xf32>
    %479 = vector.extract_strided_slice %469 {offsets = [0, 32], sizes = [8, 32], strides = [1, 1]} : vector<8x96xf32> to vector<8x32xf32>
    %480 = arith.addf %478, %479 : vector<8x32xf32>
    %481 = arith.negf %480 : vector<8x32xf32>
    %482 = math.exp %481 : vector<8x32xf32>
    %cst_129 = arith.constant 1.000000e+00 : f32
    %483 = vector.broadcast %cst_129 : f32 to vector<8x32xf32>
    %484 = arith.addf %483, %482 : vector<8x32xf32>
    %485 = arith.divf %483, %484 : vector<8x32xf32>
    %486 = vector.extract_strided_slice %467 {offsets = [0, 64], sizes = [8, 32], strides = [1, 1]} : vector<8x96xf32> to vector<8x32xf32>
    %487 = vector.extract_strided_slice %469 {offsets = [0, 64], sizes = [8, 32], strides = [1, 1]} : vector<8x96xf32> to vector<8x32xf32>
    %488 = arith.mulf %477, %487 : vector<8x32xf32>
    %489 = arith.addf %486, %488 : vector<8x32xf32>
    %490 = math.tanh %489 : vector<8x32xf32>
    %cst_130 = arith.constant 1.000000e+00 : f32
    %491 = vector.broadcast %cst_130 : f32 to vector<8x32xf32>
    %492 = arith.subf %491, %485 : vector<8x32xf32>
    %493 = arith.mulf %492, %490 : vector<8x32xf32>
    %494 = arith.mulf %485, %466 : vector<8x32xf32>
    %495 = arith.addf %493, %494 : vector<8x32xf32>
    %c0_131 = arith.constant 0 : index
    %c0_132 = arith.constant 0 : index
    %496 = vector.load %arg10[%c0_131, %c0_132] : memref<32x32xf32, #tpu.memory_space<vmem>>, vector<32x32xf32>
    %cst_133 = arith.constant dense<0.000000e+00> : vector<8x32xf32>
    %497 = tpu.matmul %495, %496, %cst_133 {dimension_numbers = #tpu.dot_dimension_numbers<[1], [0], [0], [1], [0, 0, 1, 1], [], []>} : vector<8x32xf32>, vector<32x32xf32>, vector<8x32xf32> -> vector<8x32xf32>
    %c0_134 = arith.constant 0 : index
    %c0_135 = arith.constant 0 : index
    %498 = vector.load %arg1[%c0_134, %c0_135] : memref<8x4xf32, #tpu.memory_space<vmem>>, vector<8x4xf32>
    %c0_136 = arith.constant 0 : index
    %c0_137 = arith.constant 0 : index
    %499 = vector.load %arg11[%c0_136, %c0_137] : memref<4x32xf32, #tpu.memory_space<vmem>>, vector<4x32xf32>
    %cst_138 = arith.constant dense<0.000000e+00> : vector<8x32xf32>
    %500 = tpu.matmul %498, %499, %cst_138 {dimension_numbers = #tpu.dot_dimension_numbers<[1], [0], [0], [1], [0, 0, 1, 1], [], []>} : vector<8x4xf32>, vector<4x32xf32>, vector<8x32xf32> -> vector<8x32xf32>
    %501 = arith.addf %497, %500 : vector<8x32xf32>
    %c0_139 = arith.constant 0 : index
    %c0_140 = arith.constant 0 : index
    %502 = vector.load %arg12[%c0_139, %c0_140] : memref<1x32xf32, #tpu.memory_space<vmem>>, vector<1x32xf32>
    %503 = vector.broadcast %502 : vector<1x32xf32> to vector<8x32xf32>
    %504 = arith.addf %501, %503 : vector<8x32xf32>
    %c0_141 = arith.constant 0 : index
    %c0_142 = arith.constant 0 : index
    %505 = vector.load %arg13[%c0_141, %c0_142] : memref<1x32xf32, #tpu.memory_space<vmem>>, vector<1x32xf32>
    %c0_143 = arith.constant 0 : index
    %c0_144 = arith.constant 0 : index
    %506 = vector.load %arg14[%c0_143, %c0_144] : memref<1x32xf32, #tpu.memory_space<vmem>>, vector<1x32xf32>
    %cst_145 = arith.constant dense<0.000000e+00> : vector<8xf32>
    %507 = vector.multi_reduction <add>, %504, %cst_145 [1] : vector<8x32xf32> to vector<8xf32>
    %508 = vector.shape_cast %507 : vector<8xf32> to vector<8x1xf32>
    %cst_146 = arith.constant 3.200000e+01 : f32
    %509 = vector.broadcast %cst_146 : f32 to vector<8x1xf32>
    %510 = arith.divf %508, %509 : vector<8x1xf32>
    %511 = vector.broadcast %510 : vector<8x1xf32> to vector<8x32xf32>
    %512 = arith.subf %504, %511 : vector<8x32xf32>
    %513 = arith.mulf %512, %512 : vector<8x32xf32>
    %cst_147 = arith.constant dense<0.000000e+00> : vector<8xf32>
    %514 = vector.multi_reduction <add>, %513, %cst_147 [1] : vector<8x32xf32> to vector<8xf32>
    %515 = vector.shape_cast %514 : vector<8xf32> to vector<8x1xf32>
    %cst_148 = arith.constant 3.200000e+01 : f32
    %516 = vector.broadcast %cst_148 : f32 to vector<8x1xf32>
    %517 = arith.divf %515, %516 : vector<8x1xf32>
    %518 = vector.broadcast %510 : vector<8x1xf32> to vector<8x32xf32>
    %519 = arith.subf %504, %518 : vector<8x32xf32>
    %cst_149 = arith.constant 9.99999974E-6 : f32
    %520 = vector.broadcast %cst_149 : f32 to vector<8x1xf32>
    %521 = arith.addf %517, %520 : vector<8x1xf32>
    %522 = math.rsqrt %521 : vector<8x1xf32>
    %523 = vector.broadcast %522 : vector<8x1xf32> to vector<8x32xf32>
    %524 = arith.mulf %519, %523 : vector<8x32xf32>
    %525 = vector.broadcast %505 : vector<1x32xf32> to vector<8x32xf32>
    %526 = arith.mulf %524, %525 : vector<8x32xf32>
    %527 = vector.broadcast %506 : vector<1x32xf32> to vector<8x32xf32>
    %528 = arith.addf %526, %527 : vector<8x32xf32>
    %cst_150 = arith.constant 0.000000e+00 : f32
    %529 = vector.broadcast %cst_150 : f32 to vector<8x32xf32>
    %530 = arith.maximumf %528, %529 : vector<8x32xf32>
    %c0_151 = arith.constant 0 : index
    %c0_152 = arith.constant 0 : index
    %531 = vector.load %arg15[%c0_151, %c0_152] : memref<32x32xf32, #tpu.memory_space<vmem>>, vector<32x32xf32>
    %cst_153 = arith.constant dense<0.000000e+00> : vector<8x32xf32>
    %532 = tpu.matmul %530, %531, %cst_153 {dimension_numbers = #tpu.dot_dimension_numbers<[1], [0], [0], [1], [0, 0, 1, 1], [], []>} : vector<8x32xf32>, vector<32x32xf32>, vector<8x32xf32> -> vector<8x32xf32>
    %c0_154 = arith.constant 0 : index
    %c0_155 = arith.constant 0 : index
    %533 = vector.load %arg16[%c0_154, %c0_155] : memref<1x32xf32, #tpu.memory_space<vmem>>, vector<1x32xf32>
    %534 = vector.broadcast %533 : vector<1x32xf32> to vector<8x32xf32>
    %535 = arith.addf %532, %534 : vector<8x32xf32>
    %c0_156 = arith.constant 0 : index
    %c0_157 = arith.constant 0 : index
    %536 = vector.load %arg17[%c0_156, %c0_157] : memref<1x32xf32, #tpu.memory_space<vmem>>, vector<1x32xf32>
    %c0_158 = arith.constant 0 : index
    %c0_159 = arith.constant 0 : index
    %537 = vector.load %arg18[%c0_158, %c0_159] : memref<1x32xf32, #tpu.memory_space<vmem>>, vector<1x32xf32>
    %cst_160 = arith.constant dense<0.000000e+00> : vector<8xf32>
    %538 = vector.multi_reduction <add>, %535, %cst_160 [1] : vector<8x32xf32> to vector<8xf32>
    %539 = vector.shape_cast %538 : vector<8xf32> to vector<8x1xf32>
    %cst_161 = arith.constant 3.200000e+01 : f32
    %540 = vector.broadcast %cst_161 : f32 to vector<8x1xf32>
    %541 = arith.divf %539, %540 : vector<8x1xf32>
    %542 = vector.broadcast %541 : vector<8x1xf32> to vector<8x32xf32>
    %543 = arith.subf %535, %542 : vector<8x32xf32>
    %544 = arith.mulf %543, %543 : vector<8x32xf32>
    %cst_162 = arith.constant dense<0.000000e+00> : vector<8xf32>
    %545 = vector.multi_reduction <add>, %544, %cst_162 [1] : vector<8x32xf32> to vector<8xf32>
    %546 = vector.shape_cast %545 : vector<8xf32> to vector<8x1xf32>
    %cst_163 = arith.constant 3.200000e+01 : f32
    %547 = vector.broadcast %cst_163 : f32 to vector<8x1xf32>
    %548 = arith.divf %546, %547 : vector<8x1xf32>
    %549 = vector.broadcast %541 : vector<8x1xf32> to vector<8x32xf32>
    %550 = arith.subf %535, %549 : vector<8x32xf32>
    %cst_164 = arith.constant 9.99999974E-6 : f32
    %551 = vector.broadcast %cst_164 : f32 to vector<8x1xf32>
    %552 = arith.addf %548, %551 : vector<8x1xf32>
    %553 = math.rsqrt %552 : vector<8x1xf32>
    %554 = vector.broadcast %553 : vector<8x1xf32> to vector<8x32xf32>
    %555 = arith.mulf %550, %554 : vector<8x32xf32>
    %556 = vector.broadcast %536 : vector<1x32xf32> to vector<8x32xf32>
    %557 = arith.mulf %555, %556 : vector<8x32xf32>
    %558 = vector.broadcast %537 : vector<1x32xf32> to vector<8x32xf32>
    %559 = arith.addf %557, %558 : vector<8x32xf32>
    %cst_165 = arith.constant 0.000000e+00 : f32
    %560 = vector.broadcast %cst_165 : f32 to vector<8x32xf32>
    %561 = arith.maximumf %559, %560 : vector<8x32xf32>
    %c0_166 = arith.constant 0 : index
    %c0_167 = arith.constant 0 : index
    %562 = vector.load %arg19[%c0_166, %c0_167] : memref<32x1xf32, #tpu.memory_space<vmem>>, vector<32x1xf32>
    %cst_168 = arith.constant dense<0.000000e+00> : vector<8x1xf32>
    %563 = tpu.matmul %561, %562, %cst_168 {dimension_numbers = #tpu.dot_dimension_numbers<[1], [0], [0], [1], [0, 0, 1, 1], [], []>} : vector<8x32xf32>, vector<32x1xf32>, vector<8x1xf32> -> vector<8x1xf32>
    %c0_169 = arith.constant 0 : index
    %c0_170 = arith.constant 0 : index
    %564 = vector.load %arg20[%c0_169, %c0_170] : memref<1x1xf32, #tpu.memory_space<vmem>>, vector<1x1xf32>
    %565 = vector.broadcast %564 : vector<1x1xf32> to vector<8x1xf32>
    %566 = arith.addf %563, %565 : vector<8x1xf32>
    %c0_171 = arith.constant 0 : index
    %c0_172 = arith.constant 0 : index
    %567 = vector.load %arg21[%c0_171, %c0_172] : memref<8x1xf32, #tpu.memory_space<vmem>>, vector<8x1xf32>
    tpu.vector_store %arg21[%c0_171, %c0_172], %566 {strides = array<i32>} : memref<8x1xf32, #tpu.memory_space<vmem>>, vector<8x1xf32>,
    return
  }
}

</mosaic_0001>

<bundles_post_ra>
// kernel: critic_forward.1
= control target key start
LH: loop header
LB: loop body
LE: loop exit
PB: predicated region body
PF: predicated region fallthrough
CT: control target
= control target key end

     0   :  { %vm111_vm0 = vcmask 1045504   ;;  %vm86_vm1 = vcmask 48128   ;;  %v3112_v11 = vmov 0.0|0.0   ;;  %vm3113_vm2 = vmmov 0   ;;  %s3116_s27 = smov 96   ;;  %s3662_s2 = inlined_call_operand.vmem [shape: f32[6,96], index: 2, kind: input, shape index: {}]   ;;  %s3663_s0 = inlined_call_operand.vmem [shape: f32[64,6], index: 0, kind: input, shape index: {}]   ;;  %s3664_s3 = inlined_call_operand.vmem [shape: f32[32,96], index: 3, kind: input, shape index: {}]   ;;  %s3665_s4 = inlined_call_operand.vmem [shape: f32[1,96], index: 4, kind: input, shape index: {}]   ;;  %s3666_s5 = inlined_call_operand.vmem [shape: f32[1,96], index: 5, kind: input, shape index: {}]   ;;  %s3667_s6 = inlined_call_operand.vmem [shape: f32[32,96], index: 6, kind: input, shape index: {}]   ;;  %s3668_s8 = inlined_call_operand.vmem [shape: f32[1,96], index: 8, kind: input, shape index: {}]   ;;  %s3669_s7 = inlined_call_operand.vmem [shape: f32[32,96], index: 7, kind: input, shape index: {}]   ;;  %s3670_s9 = inlined_call_operand.vmem [shape: f32[1,96], index: 9, kind: input, shape index: {}]   ;;  %s3671_s11 = inlined_call_operand.vmem [shape: f32[4,32], index: 11, kind: input, shape index: {}]   ;;  %s3672_s1 = inlined_call_operand.vmem [shape: f32[8,4], index: 1, kind: input, shape index: {}]   ;;  %s3673_s10 = inlined_call_operand.vmem [shape: f32[32,32], index: 10, kind: input, shape index: {}]   ;;  %s3674_s12 = inlined_call_operand.vmem [shape: f32[1,32], index: 12, kind: input, shape index: {}]   ;;  %s3675_s15 = inlined_call_operand.vmem [shape: f32[32,32], index: 15, kind: input, shape index: {}]   ;;  %s3676_s13 = inlined_call_operand.vmem [shape: f32[1,32], index: 13, kind: input, shape index: {}]   ;;  %s3677_s14 = inlined_call_operand.vmem [shape: f32[1,32], index: 14, kind: input, shape index: {}]   ;;  %s3678_s16 = inlined_call_operand.vmem [shape: f32[1,32], index: 16, kind: input, shape index: {}]   ;;  %s3679_s19 = inlined_call_operand.vmem [shape: f32[32,1], index: 19, kind: input, shape index: {}]   ;;  %s3680_s20 = inlined_call_operand.<no memory space> [shape: f32[1,1], index: 20, kind: input, shape index: {}]   ;;  %s3681_s17 = inlined_call_operand.vmem [shape: f32[1,32], index: 17, kind: input, shape index: {}]   ;;  %s3682_s18 = inlined_call_operand.vmem [shape: f32[1,32], index: 18, kind: input, shape index: {}]   ;;  %s3683_s21 = inlined_call_operand.vmem [shape: f32[8,1], index: 21, kind: output, shape index: {}]  }
   0x1   :  { %3687 = sst [smem:[#allocation5_spill]] %s3662_s2  ;;  %v3114_v14 = vmov 0.0   ;;  %vm220_vm3 = vcmask 785408   ;;  %vm241_vm4 = vcmask 261120   ;;  %vm2062_vm5 = vcmask 1043456  }
   0x2   :  { %3688 = sst [smem:[#allocation6_spill]] %s3663_s0  ;;  %s3693_s26 = sld [smem:[#allocation5_spill]]  ;;  %vm2058_vm6 = vcmask 31744   ;;  %vm2448_vm7 = vcmask 7168  }
   0x3   :  { %3689 = sst [smem:[#allocation7_spill]] %s3664_s3  ;;  %s3694_s28 = sld [smem:[#allocation6_spill]] }
   0x4   :  { %3690 = sst [smem:[#allocation8_spill]] %s3665_s4  ;;  %s3695_s24 = sld [smem:[#allocation7_spill]] }
   0x5   :  { %3691 = sst [smem:[#allocation9_spill]] %s3666_s5  ;;  %s3696_s0 = sld [smem:[#allocation8_spill]] }
   0x6   :  { %3692 = sst [smem:[#allocation10_spill]] %s3667_s6  ;;  %s3697_s25 = sld [smem:[#allocation9_spill]] }
   0x7   :  { %s3698_s6 = sld [smem:[#allocation10_spill]] }
   0x8   :  { %v78_v0 = vld [vmem:[%s3693_s26] sm:$0x3f]  ;;  %s3115_s26 = smov 64  }
   0x9   :  { %v70_v1 = vld [vmem:[%s3694_s28] sm:$0xff]  ;;  %2635 = vmatprep.subr.msk.mxu0 %vm111_vm0, %v78_v0  ;;  %3005 = vmatprep.subr.msk.mxu1 %vm111_vm0, %v78_v0  ;;  %v71_v3 = vld [vmem:[%s3694_s28 + $0x8] sm:$0xff]  ;;  %v76_v7 = vld [vmem:[%s3694_s28 + $0x30] sm:$0xff] }
   0xa   :  { %v74_v2 = vld [vmem:[%s3694_s28 + $0x20] sm:$0xff]  ;;  %v75_v4 = vld [vmem:[%s3694_s28 + $0x28] sm:$0xff]  ;;  %2636 = vmatpush3.msk.msra.mxu0 %vm111_vm0, %v78_v0  ;;  %3006 = vmatpush3.msk.msra.mxu1 %vm111_vm0, %v78_v0  ;;  %v231_v9 = vld [vmem:[%s3695_s24 + $0x10] sm:$0xff] }
   0xb   :  { %v229_v5 = vld [vmem:[%s3695_s24] sm:$0xff]  ;;  %v230_v6 = vld [vmem:[%s3695_s24 + $0x8] sm:$0xff]  ;;  %2637 = vmatprep.mubr.msk.f32.mxu0 %vm86_vm1, %v70_v1  ;;  %2643 = vmatprep.mubr.msk.f32.mxu1 %vm86_vm1, %v74_v2  ;;  %v232_v10 = vld [vmem:[%s3695_s24 + $0x18] sm:$0xff] }
   0xc   :  { %v3253_v8 = vpack.c.bf16 %v230_v6, %v229_v5  ;;  %2638 = vmatmul.mubr.msk.f32.vlgmr.msra.gmra.mrb[0].mxu0 %vm86_vm1, %v71_v3  ;;  %2644 = vmatmul.mubr.msk.f32.vlgmr.msra.gmra.mrb[0].mxu1 %vm86_vm1, %v75_v4  ;;  %v77_v12 = vld [vmem:[%s3694_s28 + $0x38] sm:$0xff]  ;;  %v3269_v13 = vpack.c.bf16 %v232_v10, %v231_v9  ;;  %v3292_v15 = vld [vmem:[%s3696_s0] ss:$0 sm:$0xff]  ;;  %v72_v62 = vld [vmem:[%s3694_s28 + $0x10] sm:$0xff] }
   0xd   :  { %2883 = vmatprep.subr.bf16.mxu1 %v3112_v11  ;;  %2646 = vmatprep.mubr.msk.f32.mxu1 %vm86_vm1, %v76_v7  ;;  %v3308_v28 = vld [vmem:[%s3697_s25] ss:$0 sm:$0xff]  ;;  %v73_v63 = vld [vmem:[%s3694_s28 + $0x18] sm:$0xff] }
   0xe   :  { %2885 = vmatpush3.bf16.msra.mxu1 %v3253_v8  ;;  %2895 = vmatprep.subr.bf16.mxu0 %v3112_v11 }
   0xf   :  { %2886 = vmatprep.subr.bf16.mxu1 %v3112_v11  ;;  %2897 = vmatpush3.bf16.msra.mxu0 %v3253_v8 }
  0x10   :  { %2647 = vmatmul.mubr.msk.f32.gmra.mrb[2].mxu1 %vm86_vm1, %v77_v12  ;;  %2898 = vmatprep.subr.bf16.mxu0 %v3112_v11 }
  0x11   :  { %2657 = vmatprep.mubr.msk.f32.mxu1 %vm3113_vm2, %v3114_v14  ;;  %2640 = vmatprep.mubr.msk.f32.mxu0 %vm86_vm1, %v72_v62 }
  0x12   :  { %2888 = vmatpush3.bf16.msra.mxu1 %v3269_v13  ;;  %2641 = vmatmul.mubr.msk.f32.gmra.mrb[2].mxu0 %vm86_vm1, %v73_v63 }
  0x13   :  { %2889 = vmatprep.subr.bf16.mxu1 %v3112_v11  ;;  %2900 = vmatpush3.bf16.msra.mxu0 %v3269_v13 }
  0x14   :  { %2907 = vmatprep.subr.bf16.mxu0 %v3112_v11  ;;  %2679 = vmatprep.mubr.msk.f32.mxu0 %vm3113_vm2, %v3114_v14 }
  0x15   :  { %2658 = vmatmul.mubr.f32.vlgmr.msra.gmra.mrb[4].mxu1 %v3114_v14 }
  0x16   :  { %2891 = vmatpush3.bf16.msra.mxu1 %v3253_v8  ;;  %2668 = vmatprep.mubr.msk.f32.mxu1 %vm3113_vm2, %v3114_v14 }
  0x17   :  { %2892 = vmatprep.subr.bf16.mxu1 %v3112_v11 }
  0x1a   :  { %2894 = vmatpush3.bf16.msra.mxu1 %v3269_v13 }
  0x1b   :  { %2901 = vmatprep.subr.bf16.mxu1 %v3112_v11 }
  0xdf   :  { %v2639_v16 = vpop.f32.mrb[0].mxu0  ;;  %v2645_v17 = vpop.f32.mrb[0].mxu1 }
  0xe0   :  { %v187_v18 = vadd.f32 %v2639_v16, %v3292_v15  ;;  %v207_v19 = vadd.f32 %v2645_v17, %v3292_v15  ;;  %v181_v20 = vpop.f32.mrb[1].mxu0  ;;  %v201_v21 = vpop.f32.mrb[1].mxu1 }
  0xe1   :  { %v182_v22 = vadd.f32 %v3292_v15, %v181_v20  ;;  %v202_v23 = vadd.f32 %v3292_v15, %v201_v21 }
  0xe2   :  { %222 = vst.msk [vmem:[#allocation2 + $0x8] sm:$0xff] %vm220_vm3, %v187_v18  ;;  %226 = vst.msk [vmem:[#allocation2 + $0x28] sm:$0xff] %vm220_vm3, %v207_v19 }
  0xe3   :  { %221 = vst.msk [vmem:[#allocation2] sm:$0xff] %vm220_vm3, %v182_v22  ;;  %225 = vst.msk [vmem:[#allocation2 + $0x20] sm:$0xff] %vm220_vm3, %v202_v23  ;;  %v2648_v24 = vpop.f32.mrb[2].mxu1 }
  0xe4   :  { %v217_v25 = vadd.f32 %v2648_v24, %v3292_v15  ;;  %v211_v26 = vpop.f32.mrb[3].mxu1 }
  0xe5   :  { %v212_v27 = vadd.f32 %v3292_v15, %v211_v26  ;;  %v2642_v6 = vpop.f32.mrb[2].mxu0 }
  0xe6   :  { %228 = vst.msk [vmem:[#allocation2 + $0x38] sm:$0xff] %vm220_vm3, %v217_v25  ;;  %v197_v7 = vadd.f32 %v2642_v6, %v3292_v15  ;;  %v191_v9 = vpop.f32.mrb[3].mxu0 }
  0xe7   :  { %227 = vst.msk [vmem:[#allocation2 + $0x30] sm:$0xff] %vm220_vm3, %v212_v27  ;;  %v192_v10 = vadd.f32 %v3292_v15, %v191_v9 }
  0xe8   :  { %v311_v29 = vpop.f32.mrb[4].mxu1  ;;  %224 = vst.msk [vmem:[#allocation2 + $0x18] sm:$0xff] %vm220_vm3, %v197_v7 }
  0xe9   :  { %v312_v30 = vadd.f32 %v3308_v28, %v311_v29  ;;  %v2659_v31 = vpop.f32.mrb[5].mxu1  ;;  %v346_v52 = vld [vmem:[#allocation2 + $0x8] sm:$0xff]  ;;  %223 = vst.msk [vmem:[#allocation2 + $0x10] sm:$0xff] %vm220_vm3, %v192_v10 }
  0xea   :  { %v240_v32 = vld [vmem:[#allocation2] sm:$0xff] }
  0xeb   :  { %323 = vrot.lane.b32.xlu0 %v312_v30, %s3115_s26  ;;  %v315_v33 = vadd.f32 %v312_v30, %v240_v32 }
  0xed   :  { %v2465_v34 = vmul.f32 -1.442695, %v315_v33 }
  0xef   :  { %3012 = vpow2.f32 %v2465_v34 }
  0xf0   :  { %v450_v18 = vld [vmem:[#allocation2 + $0x10] sm:$0xff] }
  0xf9   :  { %v3013_v35 = vpop.eup %3012 }
  0xfa   :  { %v319_v36 = vadd.f32 1.0, %v3013_v35 }
  0xfc   :  { %3014 = vrcp.f32 %v319_v36 }
 0x106   :  { %v3015_v37 = vpop.eup %3014 }
 0x107   :  { %v333_v43 = vsub.f32 1.0, %v3015_v37  ;;  %v339_v45 = vmul.f32 0.0, %v3015_v37 }
 0x15d   :  { %v324_v38 = vpop.permute.xlu0 %323 }
 0x15e   :  { %v326_v39 = vmul.f32 %v3015_v37, %v324_v38 }
 0x160   :  { %328 = vrot.lane.b32.xlu0 %v326_v39, %s3115_s26  ;;  %v554_v39 = vld [vmem:[#allocation2 + $0x18] sm:$0xff] }
 0x1d2   :  { %v329_v40 = vpop.permute.xlu0 %328 }
 0x1d3   :  { %v331_v41 = vadd.f32 %v329_v40, %v240_v32 }
 0x1d5   :  { %3016 = vtanh.f32 %v331_v41 }
 0x1df   :  { %v3017_v42 = vpop.eup %3016 }
 0x1e0   :  { %335 = vrot.lane.b32.xlu1 %v3017_v42, %s3116_s27 }
 0x252   :  { %v336_v44 = vpop.permute.xlu1 %335 }
 0x253   :  { %v338_v46 = vmul.f32 %v336_v44, %v333_v43 }
 0x255   :  { %v340_v47 = vadd.f32 %v339_v45, %v338_v46 }
 0x257   :  { %342 = vrot.lane.b32.xlu1 %v340_v47, %s3116_s27 }
 0x2c9   :  { %v343_v48 = vpop.permute.xlu1 %342 }
 0x2ca   :  { %345 = vst.msk [vmem:[#allocation3] sm:$0xff] %vm241_vm4, %v343_v48  ;;  %2669 = vmatmul.mubr.msk.f32.vlgmr.msra.gmra.mrb[6].mxu1 %vm241_vm4, %v343_v48 }
 0x2cb   :  { %2903 = vmatpush3.bf16.msra.mxu1 %v3253_v8  ;;  %2690 = vmatprep.mubr.msk.f32.mxu1 %vm3113_vm2, %v3114_v14 }
 0x2cc   :  { %2904 = vmatprep.subr.bf16.mxu1 %v3112_v11 }
 0x2cf   :  { %2906 = vmatpush3.bf16.msra.mxu1 %v3269_v13 }
 0x2d0   :  { %2913 = vmatprep.subr.bf16.mxu1 %v3112_v11 }
 0x39d   :  { %v415_v49 = vpop.f32.mrb[6].mxu1 }
 0x39e   :  { %v416_v50 = vadd.f32 %v3308_v28, %v415_v49  ;;  %v2670_v51 = vpop.f32.mrb[7].mxu1 }
 0x3a0   :  { %427 = vrot.lane.b32.xlu0 %v416_v50, %s3115_s26  ;;  %v419_v53 = vadd.f32 %v416_v50, %v346_v52 }
 0x3a2   :  { %v2467_v54 = vmul.f32 -1.442695, %v419_v53 }
 0x3a4   :  { %3018 = vpow2.f32 %v2467_v54 }
 0x3ae   :  { %v3019_v55 = vpop.eup %3018 }
 0x3af   :  { %v423_v56 = vadd.f32 1.0, %v3019_v55 }
 0x3b1   :  { %3020 = vrcp.f32 %v423_v56 }
 0x3bb   :  { %v3021_v57 = vpop.eup %3020 }
 0x3bc   :  { %v437_v1 = vsub.f32 1.0, %v3021_v57  ;;  %v443_v3 = vmul.f32 %v3021_v57, %v340_v47 }
 0x412   :  { %v428_v58 = vpop.permute.xlu0 %427 }
 0x413   :  { %v430_v59 = vmul.f32 %v3021_v57, %v428_v58 }
 0x415   :  { %432 = vrot.lane.b32.xlu1 %v430_v59, %s3115_s26  ;;  %v658_v59 = vld [vmem:[#allocation2 + $0x20] sm:$0xff] }
 0x487   :  { %v433_v60 = vpop.permute.xlu1 %432 }
 0x488   :  { %v435_v61 = vadd.f32 %v433_v60, %v346_v52 }
 0x48a   :  { %3022 = vtanh.f32 %v435_v61 }
 0x494   :  { %v3023_v0 = vpop.eup %3022 }
 0x495   :  { %439 = vrot.lane.b32.xlu0 %v3023_v0, %s3116_s27 }
 0x507   :  { %v440_v2 = vpop.permute.xlu0 %439 }
 0x508   :  { %v442_v4 = vmul.f32 %v440_v2, %v437_v1 }
 0x50a   :  { %v444_v5 = vadd.f32 %v443_v3, %v442_v4 }
 0x50c   :  { %446 = vrot.lane.b32.xlu1 %v444_v5, %s3116_s27 }
 0x57e   :  { %v447_v12 = vpop.permute.xlu1 %446 }
 0x57f   :  { %449 = vst.msk [vmem:[#allocation3 + $0x8] sm:$0xff] %vm241_vm4, %v447_v12  ;;  %2680 = vmatmul.mubr.msk.f32.vlgmr.msra.gmra.mrb[4].mxu0 %vm241_vm4, %v447_v12 }
 0x580   :  { %2909 = vmatpush3.bf16.msra.mxu0 %v3253_v8  ;;  %2701 = vmatprep.mubr.msk.f32.mxu0 %vm3113_vm2, %v3114_v14 }
 0x581   :  { %2910 = vmatprep.subr.bf16.mxu0 %v3112_v11 }
 0x584   :  { %2912 = vmatpush3.bf16.msra.mxu0 %v3269_v13 }
 0x585   :  { %2919 = vmatprep.subr.bf16.mxu0 %v3112_v11 }
 0x652   :  { %v519_v15 = vpop.f32.mrb[4].mxu0 }
 0x653   :  { %v520_v16 = vadd.f32 %v3308_v28, %v519_v15  ;;  %v2681_v17 = vpop.f32.mrb[5].mxu0 }
 0x655   :  { %531 = vrot.lane.b32.xlu0 %v520_v16, %s3115_s26  ;;  %v523_v19 = vadd.f32 %v520_v16, %v450_v18 }
 0x657   :  { %v2469_v20 = vmul.f32 -1.442695, %v523_v19  ;;  %v762_v19 = vld [vmem:[#allocation2 + $0x28] sm:$0xff] }
 0x659   :  { %3024 = vpow2.f32 %v2469_v20 }
 0x663   :  { %v3025_v21 = vpop.eup %3024 }
 0x664   :  { %v527_v22 = vadd.f32 1.0, %v3025_v21 }
 0x666   :  { %3026 = vrcp.f32 %v527_v22 }
 0x670   :  { %v3027_v23 = vpop.eup %3026 }
 0x671   :  { %v541_v30 = vsub.f32 1.0, %v3027_v23  ;;  %v547_v32 = vmul.f32 %v3027_v23, %v444_v5 }
 0x6c7   :  { %v532_v24 = vpop.permute.xlu0 %531 }
 0x6c8   :  { %v534_v25 = vmul.f32 %v3027_v23, %v532_v24 }
 0x6ca   :  { %536 = vrot.lane.b32.xlu1 %v534_v25, %s3115_s26 }
 0x73c   :  { %v537_v26 = vpop.permute.xlu1 %536 }
 0x73d   :  { %v539_v27 = vadd.f32 %v537_v26, %v450_v18 }
 0x73f   :  { %3028 = vtanh.f32 %v539_v27  ;;  %v1082_v27 = vld [vmem:[%s3698_s6] sm:$0xff] }
 0x749   :  { %v3029_v29 = vpop.eup %3028 }
 0x74a   :  { %543 = vrot.lane.b32.xlu0 %v3029_v29, %s3116_s27  ;;  %v1083_v29 = vld [vmem:[%s3698_s6 + $0x8] sm:$0xff] }
 0x7bc   :  { %v544_v31 = vpop.permute.xlu0 %543 }
 0x7bd   :  { %v546_v33 = vmul.f32 %v544_v31, %v541_v30  ;;  %v2931_v30 = vpack.c.bf16 %v1083_v29, %v1082_v27  ;;  %v3483_v27 = vld [vmem:[%s3670_s9] ss:$0 sm:$0xff] }
 0x7bf   :  { %v548_v34 = vadd.f32 %v547_v32, %v546_v33 }
 0x7c1   :  { %550 = vrot.lane.b32.xlu1 %v548_v34, %s3116_s27 }
 0x833   :  { %v551_v35 = vpop.permute.xlu1 %550 }
 0x834   :  { %553 = vst.msk [vmem:[#allocation3 + $0x10] sm:$0xff] %vm241_vm4, %v551_v35  ;;  %2691 = vmatmul.mubr.msk.f32.vlgmr.msra.gmra.mrb[8].mxu1 %vm241_vm4, %v551_v35 }
 0x835   :  { %2915 = vmatpush3.bf16.msra.mxu1 %v3253_v8  ;;  %2712 = vmatprep.mubr.msk.f32.mxu1 %vm3113_vm2, %v3114_v14 }
 0x836   :  { %2916 = vmatprep.subr.bf16.mxu1 %v3112_v11 }
 0x839   :  { %2918 = vmatpush3.bf16.msra.mxu1 %v3269_v13 }
 0x83a   :  { %2925 = vmatprep.subr.bf16.mxu1 %v3112_v11 }
 0x907   :  { %v623_v36 = vpop.f32.mrb[8].mxu1 }
 0x908   :  { %v624_v37 = vadd.f32 %v3308_v28, %v623_v36  ;;  %v2692_v38 = vpop.f32.mrb[9].mxu1 }
 0x909   :  { %v1085_v38 = vld [vmem:[%s3698_s6 + $0x18] sm:$0xff] }
 0x90a   :  { %635 = vrot.lane.b32.xlu0 %v624_v37, %s3115_s26  ;;  %v627_v40 = vadd.f32 %v624_v37, %v554_v39  ;;  %v1084_v37 = vld [vmem:[%s3698_s6 + $0x10] sm:$0xff] }
 0x90c   :  { %v2471_v41 = vmul.f32 -1.442695, %v627_v40 }
 0x90e   :  { %3030 = vpow2.f32 %v2471_v41  ;;  %v1074_v41 = vld [vmem:[#allocation3] sm:$0xff] }
 0x918   :  { %v3031_v42 = vpop.eup %3030 }
 0x919   :  { %v631_v43 = vadd.f32 1.0, %v3031_v42  ;;  %v1075_v42 = vld [vmem:[#allocation3 + $0x8] sm:$0xff] }
 0x91b   :  { %3032 = vrcp.f32 %v631_v43  ;;  %v1076_v43 = vld [vmem:[#allocation3 + $0x10] sm:$0xff] }
 0x925   :  { %v3033_v44 = vpop.eup %3032 }
 0x926   :  { %v645_v50 = vsub.f32 1.0, %v3033_v44  ;;  %v651_v52 = vmul.f32 %v3033_v44, %v548_v34 }
 0x97c   :  { %v636_v45 = vpop.permute.xlu0 %635 }
 0x97d   :  { %v638_v46 = vmul.f32 %v3033_v44, %v636_v45 }
 0x97f   :  { %640 = vrot.lane.b32.xlu1 %v638_v46, %s3115_s26 }
 0x9f1   :  { %v641_v47 = vpop.permute.xlu1 %640 }
 0x9f2   :  { %v643_v48 = vadd.f32 %v641_v47, %v554_v39  ;;  %v2935_v39 = vpack.c.bf16 %v1085_v38, %v1084_v37 }
 0x9f4   :  { %3034 = vtanh.f32 %v643_v48 }
 0x9fe   :  { %v3035_v49 = vpop.eup %3034 }
 0x9ff   :  { %647 = vrot.lane.b32.xlu0 %v3035_v49, %s3116_s27 }
 0xa71   :  { %v648_v51 = vpop.permute.xlu0 %647 }
 0xa72   :  { %v650_v53 = vmul.f32 %v648_v51, %v645_v50  ;;  %v3423_v50 = vld [vmem:[%s3668_s8] ss:$0 sm:$0xff] }
 0xa74   :  { %v652_v54 = vadd.f32 %v651_v52, %v650_v53 }
 0xa76   :  { %654 = vrot.lane.b32.xlu1 %v652_v54, %s3116_s27 }
 0xae8   :  { %v655_v55 = vpop.permute.xlu1 %654 }
 0xae9   :  { %657 = vst.msk [vmem:[#allocation3 + $0x18] sm:$0xff] %vm241_vm4, %v655_v55  ;;  %2702 = vmatmul.mubr.msk.f32.vlgmr.msra.gmra.mrb[6].mxu0 %vm241_vm4, %v655_v55 }
 0xaea   :  { %2921 = vmatpush3.bf16.msra.mxu0 %v3253_v8  ;;  %2723 = vmatprep.mubr.msk.f32.mxu0 %vm3113_vm2, %v3114_v14 }
 0xaeb   :  { %2922 = vmatprep.subr.bf16.mxu0 %v3112_v11 }
 0xaee   :  { %2924 = vmatpush3.bf16.msra.mxu0 %v3269_v13 }
 0xaef   :  { %2932 = vmatprep.subr.bf16.mxu0 %v2931_v30 }
 0xaf0   :  { %v1077_v44 = vld [vmem:[#allocation3 + $0x18] sm:$0xff] }
 0xbbc   :  { %v727_v56 = vpop.f32.mrb[6].mxu0 }
 0xbbd   :  { %v728_v57 = vadd.f32 %v3308_v28, %v727_v56  ;;  %v2703_v58 = vpop.f32.mrb[7].mxu0 }
 0xbbf   :  { %739 = vrot.lane.b32.xlu0 %v728_v57, %s3115_s26  ;;  %v731_v60 = vadd.f32 %v728_v57, %v658_v59 }
 0xbc1   :  { %v2473_v61 = vmul.f32 -1.442695, %v731_v60 }
 0xbc3   :  { %3036 = vpow2.f32 %v2473_v61 }
 0xbcd   :  { %v3037_v62 = vpop.eup %3036 }
 0xbce   :  { %v735_v63 = vadd.f32 1.0, %v3037_v62 }
 0xbd0   :  { %3038 = vrcp.f32 %v735_v63  ;;  %v866_v63 = vld [vmem:[#allocation2 + $0x30] sm:$0xff] }
 0xbda   :  { %v3039_v0 = vpop.eup %3038 }
 0xbdb   :  { %v749_v6 = vsub.f32 1.0, %v3039_v0  ;;  %v755_v9 = vmul.f32 %v3039_v0, %v652_v54 }
 0xc31   :  { %v740_v1 = vpop.permute.xlu0 %739 }
 0xc32   :  { %v742_v2 = vmul.f32 %v3039_v0, %v740_v1 }
 0xc34   :  { %744 = vrot.lane.b32.xlu1 %v742_v2, %s3115_s26 }
 0xca6   :  { %v745_v3 = vpop.permute.xlu1 %744 }
 0xca7   :  { %v747_v4 = vadd.f32 %v745_v3, %v658_v59 }
 0xca9   :  { %3040 = vtanh.f32 %v747_v4 }
 0xcb3   :  { %v3041_v5 = vpop.eup %3040 }
 0xcb4   :  { %751 = vrot.lane.b32.xlu0 %v3041_v5, %s3116_s27 }
 0xd26   :  { %v752_v7 = vpop.permute.xlu0 %751 }
 0xd27   :  { %v754_v10 = vmul.f32 %v752_v7, %v749_v6 }
 0xd29   :  { %v756_v12 = vadd.f32 %v755_v9, %v754_v10 }
 0xd2b   :  { %758 = vrot.lane.b32.xlu1 %v756_v12, %s3116_s27 }
 0xd9d   :  { %v759_v15 = vpop.permute.xlu1 %758 }
 0xd9e   :  { %761 = vst.msk [vmem:[#allocation3 + $0x20] sm:$0xff] %vm241_vm4, %v759_v15  ;;  %2713 = vmatmul.mubr.msk.f32.vlgmr.msra.gmra.mrb[10].mxu1 %vm241_vm4, %v759_v15  ;;  %v1231_v15 = vld [vmem:[%s3669_s7 + $0x8] sm:$0xff] }
 0xd9f   :  { %2927 = vmatpush3.bf16.msra.mxu1 %v3253_v8  ;;  %2734 = vmatprep.mubr.msk.f32.mxu1 %vm3113_vm2, %v3114_v14 }
 0xda0   :  { %2928 = vmatprep.subr.bf16.mxu1 %v3112_v11 }
 0xda3   :  { %2930 = vmatpush3.bf16.msra.mxu1 %v3269_v13 }
 0xda4   :  { %2939 = vmatprep.subr.bf16.mxu1 %v3112_v11 }
 0xda5   :  { %v1078_v45 = vld [vmem:[#allocation3 + $0x20] sm:$0xff] }
 0xe71   :  { %v831_v16 = vpop.f32.mrb[10].mxu1 }
 0xe72   :  { %v832_v17 = vadd.f32 %v3308_v28, %v831_v16  ;;  %v2714_v18 = vpop.f32.mrb[11].mxu1 }
 0xe73   :  { %v1233_v18 = vld [vmem:[%s3669_s7 + $0x18] sm:$0xff] }
 0xe74   :  { %843 = vrot.lane.b32.xlu0 %v832_v17, %s3115_s26  ;;  %v835_v20 = vadd.f32 %v832_v17, %v762_v19  ;;  %v1232_v17 = vld [vmem:[%s3669_s7 + $0x10] sm:$0xff] }
 0xe76   :  { %v2475_v21 = vmul.f32 -1.442695, %v835_v20 }
 0xe78   :  { %3042 = vpow2.f32 %v2475_v21 }
 0xe82   :  { %v3043_v8 = vpop.eup %3042 }
 0xe83   :  { %v839_v22 = vadd.f32 1.0, %v3043_v8 }
 0xe85   :  { %3044 = vrcp.f32 %v839_v22 }
 0xe8f   :  { %v3045_v23 = vpop.eup %3044 }
 0xe90   :  { %v853_v32 = vsub.f32 1.0, %v3045_v23  ;;  %v859_v34 = vmul.f32 %v3045_v23, %v756_v12  ;;  %v1230_v12 = vld [vmem:[%s3669_s7] sm:$0xff] }
 0xe91   :  { %v3445_v16 = vpack.c.bf16 %v1231_v15, %v1230_v12 }
 0xee6   :  { %v844_v24 = vpop.permute.xlu0 %843 }
 0xee7   :  { %v846_v25 = vmul.f32 %v3045_v23, %v844_v24 }
 0xee9   :  { %848 = vrot.lane.b32.xlu1 %v846_v25, %s3115_s26 }
 0xf5b   :  { %v849_v13 = vpop.permute.xlu1 %848 }
 0xf5c   :  { %v851_v26 = vadd.f32 %v849_v13, %v762_v19  ;;  %v3455_v19 = vpack.c.bf16 %v1233_v18, %v1232_v17 }
 0xf5e   :  { %3046 = vtanh.f32 %v851_v26 }
 0xf68   :  { %v3047_v31 = vpop.eup %3046 }
 0xf69   :  { %855 = vrot.lane.b32.xlu0 %v3047_v31, %s3116_s27 }
 0xfdb   :  { %v856_v33 = vpop.permute.xlu0 %855 }
 0xfdc   :  { %v858_v35 = vmul.f32 %v856_v33, %v853_v32 }
 0xfde   :  { %v3399_v36 = vadd.f32 %v859_v34, %v858_v35 }
 0xfe0   :  { %862 = vrot.lane.b32.xlu1 %v3399_v36, %s3116_s27 }
0x1052   :  { %v863_v40 = vpop.permute.xlu1 %862 }
0x1053   :  { %865 = vst.msk [vmem:[#allocation3 + $0x28] sm:$0xff] %vm241_vm4, %v863_v40  ;;  %2724 = vmatmul.mubr.msk.f32.vlgmr.msra.gmra.mrb[8].mxu0 %vm241_vm4, %v863_v40 }
0x1054   :  { %2934 = vmatpush3.bf16.msra.mxu0 %v2931_v30  ;;  %2745 = vmatprep.mubr.msk.f32.mxu0 %vm241_vm4, %v1074_v41 }
0x1055   :  { %2936 = vmatprep.subr.bf16.mxu0 %v2935_v39 }
0x1058   :  { %2938 = vmatpush3.bf16.msra.mxu0 %v2935_v39 }
0x1059   :  { %2951 = vmatprep.subr.bf16.mxu0 %v3112_v11 }
0x105a   :  { %v1079_v46 = vld [vmem:[#allocation3 + $0x28] sm:$0xff] }
0x105b   :  { %2746 = vmatmul.mubr.msk.f32.vlgmr.msra.gmra.mrb[10].mxu0 %vm241_vm4, %v1075_v42 }
0x105c   :  { %2748 = vmatprep.mubr.msk.f32.mxu0 %vm241_vm4, %v1076_v43  ;;  %2953 = vmatpush3.bf16.msra.mxu0 %v3445_v16 }
0x105d   :  { %2954 = vmatprep.subr.bf16.mxu0 %v3112_v11 }
0x105f   :  { %2749 = vmatmul.mubr.msk.f32.gmra.mrb[12].mxu0 %vm241_vm4, %v1077_v44  ;;  %v970_v44 = vld [vmem:[#allocation2 + $0x38] sm:$0xff] }
0x1060   :  { %2751 = vmatprep.mubr.msk.f32.mxu0 %vm241_vm4, %v1078_v45  ;;  %2956 = vmatpush3.bf16.msra.mxu0 %v3455_v19 }
0x1061   :  { %2963 = vmatprep.subr.bf16.mxu0 %v3112_v11 }
0x1063   :  { %2752 = vmatmul.mubr.msk.f32.gmra.mrb[14].mxu0 %vm241_vm4, %v1079_v46 }
0x1126   :  { %v935_v47 = vpop.f32.mrb[8].mxu0 }
0x1127   :  { %v936_v48 = vadd.f32 %v3308_v28, %v935_v47  ;;  %v2725_v49 = vpop.f32.mrb[9].mxu0 }
0x1129   :  { %947 = vrot.lane.b32.xlu0 %v936_v48, %s3115_s26  ;;  %v939_v0 = vadd.f32 %v936_v48, %v866_v63 }
0x112b   :  { %v2477_v1 = vmul.f32 -1.442695, %v939_v0 }
0x112d   :  { %3048 = vpow2.f32 %v2477_v1 }
0x112e   :  { %v2747_v51 = vpop.f32.mrb[10].mxu0 }
0x112f   :  { %v1189_v52 = vadd.f32 %v2747_v51, %v3423_v50  ;;  %v1183_v53 = vpop.f32.mrb[11].mxu0 }
0x1130   :  { %v1184_v54 = vadd.f32 %v3423_v50, %v1183_v53 }
0x1131   :  { %1223 = vst.msk [vmem:[#allocation2 + $0x8] sm:$0xff] %vm220_vm3, %v1189_v52 }
0x1132   :  { %1222 = vst.msk [vmem:[#allocation2] sm:$0xff] %vm220_vm3, %v1184_v54  ;;  %v2750_v55 = vpop.f32.mrb[12].mxu0 }
0x1133   :  { %v1199_v56 = vadd.f32 %v2750_v55, %v3423_v50  ;;  %v1193_v57 = vpop.f32.mrb[13].mxu0 }
0x1134   :  { %v1194_v58 = vadd.f32 %v3423_v50, %v1193_v57 }
0x1135   :  { %1225 = vst.msk [vmem:[#allocation2 + $0x18] sm:$0xff] %vm220_vm3, %v1199_v56 }
0x1136   :  { %1224 = vst.msk [vmem:[#allocation2 + $0x10] sm:$0xff] %vm220_vm3, %v1194_v58  ;;  %v2753_v59 = vpop.f32.mrb[14].mxu0 }
0x1137   :  { %v1209_v60 = vadd.f32 %v2753_v59, %v3423_v50  ;;  %v1203_v61 = vpop.f32.mrb[15].mxu0  ;;  %v3049_v2 = vpop.eup %3048 }
0x1138   :  { %v1204_v62 = vadd.f32 %v3423_v50, %v1203_v61  ;;  %v943_v3 = vadd.f32 1.0, %v3049_v2 }
0x1139   :  { %1227 = vst.msk [vmem:[#allocation2 + $0x28] sm:$0xff] %vm220_vm3, %v1209_v60  ;;  %v1241_v32 = vld [vmem:[#allocation2] sm:$0xff] }
0x113a   :  { %1226 = vst.msk [vmem:[#allocation2 + $0x20] sm:$0xff] %vm220_vm3, %v1204_v62  ;;  %3050 = vrcp.f32 %v943_v3 }
0x1144   :  { %v3051_v4 = vpop.eup %3050 }
0x1145   :  { %v957_v20 = vsub.f32 1.0, %v3051_v4  ;;  %v963_v8 = vmul.f32 %v3051_v4, %v3399_v36 }
0x119b   :  { %v948_v5 = vpop.permute.xlu0 %947 }
0x119c   :  { %v950_v6 = vmul.f32 %v3051_v4, %v948_v5 }
0x119e   :  { %952 = vrot.lane.b32.xlu1 %v950_v6, %s3115_s26 }
0x1210   :  { %v953_v7 = vpop.permute.xlu1 %952 }
0x1211   :  { %v955_v9 = vadd.f32 %v953_v7, %v866_v63  ;;  %v1338_v7 = vld [vmem:[#allocation2 + $0x8] sm:$0xff] }
0x1213   :  { %3052 = vtanh.f32 %v955_v9 }
0x121d   :  { %v3053_v10 = vpop.eup %3052 }
0x121e   :  { %959 = vrot.lane.b32.xlu0 %v3053_v10, %s3116_s27 }
0x1290   :  { %v960_v21 = vpop.permute.xlu0 %959 }
0x1291   :  { %v962_v22 = vmul.f32 %v960_v21, %v957_v20 }
0x1293   :  { %v3460_v23 = vadd.f32 %v963_v8, %v962_v22 }
0x1295   :  { %966 = vrot.lane.b32.xlu1 %v3460_v23, %s3116_s27 }
0x1307   :  { %v967_v24 = vpop.permute.xlu1 %966 }
0x1308   :  { %969 = vst.msk [vmem:[#allocation3 + $0x30] sm:$0xff] %vm241_vm4, %v967_v24  ;;  %2735 = vmatmul.mubr.msk.f32.vlgmr.msra.gmra.mrb[12].mxu1 %vm241_vm4, %v967_v24 }
0x1309   :  { %2941 = vmatpush3.bf16.msra.mxu1 %v3445_v16  ;;  %2765 = vmatprep.mubr.msk.f32.mxu1 %vm3113_vm2, %v3114_v14 }
0x130a   :  { %2942 = vmatprep.subr.bf16.mxu1 %v3112_v11 }
0x130d   :  { %2944 = vmatpush3.bf16.msra.mxu1 %v3455_v19 }
0x130e   :  { %2945 = vmatprep.subr.bf16.mxu1 %v3112_v11 }
0x130f   :  { %v1080_v25 = vld [vmem:[#allocation3 + $0x30] sm:$0xff] }
0x1310   :  { %2766 = vmatmul.mubr.f32.vlgmr.msra.gmra.mrb[14].mxu1 %v3114_v14  ;;  %2754 = vmatprep.mubr.msk.f32.mxu0 %vm241_vm4, %v1080_v25 }
0x1311   :  { %2947 = vmatpush3.bf16.msra.mxu1 %v3445_v16  ;;  %2776 = vmatprep.mubr.msk.f32.mxu1 %vm3113_vm2, %v3114_v14 }
0x1312   :  { %2948 = vmatprep.subr.bf16.mxu1 %v3112_v11 }
0x1315   :  { %2950 = vmatpush3.bf16.msra.mxu1 %v3455_v19 }
0x1316   :  { %2957 = vmatprep.subr.bf16.mxu1 %v3112_v11 }
0x13db   :  { %v1039_v13 = vpop.f32.mrb[12].mxu1 }
0x13dc   :  { %v2736_v26 = vpop.f32.mrb[13].mxu1  ;;  %v1040_v43 = vadd.f32 %v3308_v28, %v1039_v13 }
0x13de   :  { %v1043_v45 = vadd.f32 %v1040_v43, %v970_v44 }
0x13e0   :  { %v2479_v46 = vmul.f32 -1.442695, %v1043_v45 }
0x13e3   :  { %v1308_v29 = vpop.f32.mrb[14].mxu1 }
0x13e4   :  { %v1309_v30 = vadd.f32 %v3483_v27, %v1308_v29  ;;  %v2767_v31 = vpop.f32.mrb[15].mxu1 }
0x13e6   :  { %1320 = vrot.lane.b32.xlu0 %v1309_v30, %s3115_s26  ;;  %v1312_v33 = vadd.f32 %v1309_v30, %v1241_v32 }
0x13e8   :  { %v2490_v34 = vmul.f32 -1.442695, %v1312_v33 }
0x13ea   :  { %3054 = vpow2.f32 %v2490_v34 }
0x13f4   :  { %v3055_v35 = vpop.eup %3054 }
0x13f5   :  { %v1316_v36 = vadd.f32 1.0, %v3055_v35 }
0x13f7   :  { %3056 = vrcp.f32 %v1316_v36  ;;  %v1440_v36 = vld [vmem:[#allocation2 + $0x10] sm:$0xff] }
0x1401   :  { %v3057_v37 = vpop.eup %3056 }
0x1402   :  { %v1330_v49 = vsub.f32 1.0, %v3057_v37  ;;  %v1336_v52 = vmul.f32 0.0, %v3057_v37 }
0x1458   :  { %v1321_v38 = vpop.permute.xlu0 %1320 }
0x1459   :  { %v1323_v39 = vmul.f32 %v3057_v37, %v1321_v38 }
0x145b   :  { %1325 = vrot.lane.b32.xlu1 %v1323_v39, %s3115_s26 }
0x14cd   :  { %v1326_v40 = vpop.permute.xlu1 %1325 }
0x14ce   :  { %v1328_v41 = vadd.f32 %v1326_v40, %v1241_v32 }
0x14d0   :  { %3058 = vtanh.f32 %v1328_v41 }
0x14d1   :  { %3060 = vpow2.f32 %v2479_v46 }
0x14da   :  { %v3059_v42 = vpop.eup %3058 }
0x14db   :  { %1332 = vrot.lane.b32.xlu0 %v3059_v42, %s3116_s27  ;;  %v3061_v47 = vpop.eup %3060 }
0x14dc   :  { %v1047_v48 = vadd.f32 1.0, %v3061_v47 }
0x14de   :  { %3062 = vrcp.f32 %v1047_v48 }
0x14df   :  { %1051 = vrot.lane.b32.xlu0 %v1040_v43, %s3115_s26 }
0x14e8   :  { %v3063_v55 = vpop.eup %3062 }
0x14e9   :  { %v1061_v61 = vsub.f32 1.0, %v3063_v55  ;;  %v1067_v63 = vmul.f32 %v3063_v55, %v3460_v23 }
0x154d   :  { %v1333_v51 = vpop.permute.xlu0 %1332 }
0x154e   :  { %v1335_v53 = vmul.f32 %v1333_v51, %v1330_v49 }
0x1550   :  { %v1337_v54 = vadd.f32 %v1336_v52, %v1335_v53 }
0x1551   :  { %v1052_v56 = vpop.permute.xlu0 %1051 }
0x1552   :  { %v1054_v57 = vmul.f32 %v3063_v55, %v1052_v56  ;;  %1340 = vrot.lane.b32.xlu1 %v1337_v54, %s3116_s27 }
0x1554   :  { %1056 = vrot.lane.b32.xlu0 %v1054_v57, %s3115_s26  ;;  %v1542_v57 = vld [vmem:[#allocation2 + $0x18] sm:$0xff] }
0x15c4   :  { %v1341_v28 = vpop.permute.xlu1 %1340 }
0x15c5   :  { %2777 = vmatmul.mubr.msk.f32.vlgmr.msra.gmra.mrb[16].mxu1 %vm241_vm4, %v1341_v28 }
0x15c6   :  { %v1057_v58 = vpop.permute.xlu0 %1056  ;;  %2959 = vmatpush3.bf16.msra.mxu1 %v3445_v16  ;;  %2798 = vmatprep.mubr.msk.f32.mxu1 %vm3113_vm2, %v3114_v14 }
0x15c7   :  { %v1059_v59 = vadd.f32 %v1057_v58, %v970_v44  ;;  %2960 = vmatprep.subr.bf16.mxu1 %v3112_v11 }
0x15c9   :  { %3064 = vtanh.f32 %v1059_v59 }
0x15ca   :  { %2962 = vmatpush3.bf16.msra.mxu1 %v3455_v19 }
0x15cb   :  { %2969 = vmatprep.subr.bf16.mxu1 %v3112_v11 }
0x15d3   :  { %v3065_v60 = vpop.eup %3064 }
0x15d4   :  { %1063 = vrot.lane.b32.xlu0 %v3065_v60, %s3116_s27 }
0x1646   :  { %v1064_v62 = vpop.permute.xlu0 %1063 }
0x1647   :  { %v1066_v0 = vmul.f32 %v1064_v62, %v1061_v61 }
0x1649   :  { %v1068_v1 = vadd.f32 %v1067_v63, %v1066_v0 }
0x164b   :  { %1070 = vrot.lane.b32.xlu0 %v1068_v1, %s3116_s27 }
0x1698   :  { %v1410_v2 = vpop.f32.mrb[16].mxu1 }
0x1699   :  { %v1411_v3 = vadd.f32 %v3483_v27, %v1410_v2  ;;  %v2778_v4 = vpop.f32.mrb[17].mxu1 }
0x169b   :  { %1422 = vrot.lane.b32.xlu1 %v1411_v3, %s3115_s26  ;;  %v1414_v9 = vadd.f32 %v1411_v3, %v1338_v7 }
0x169d   :  { %v2492_v10 = vmul.f32 -1.442695, %v1414_v9 }
0x169f   :  { %3066 = vpow2.f32 %v2492_v10 }
0x16a9   :  { %v3067_v12 = vpop.eup %3066 }
0x16aa   :  { %v1418_v15 = vadd.f32 1.0, %v3067_v12 }
0x16ac   :  { %3068 = vrcp.f32 %v1418_v15 }
0x16b6   :  { %v3069_v17 = vpop.eup %3068 }
0x16b7   :  { %v1432_v26 = vsub.f32 1.0, %v3069_v17  ;;  %v1438_v30 = vmul.f32 %v3069_v17, %v1337_v54 }
0x16bd   :  { %v1071_v5 = vpop.permute.xlu0 %1070 }
0x16be   :  { %1073 = vst.msk [vmem:[#allocation3 + $0x38] sm:$0xff] %vm241_vm4, %v1071_v5 }
0x16c5   :  { %v1081_v6 = vld [vmem:[#allocation3 + $0x38] sm:$0xff] }
0x16c6   :  { %2755 = vmatmul.mubr.msk.f32.gmra.mrb[16].mxu0 %vm241_vm4, %v1081_v6 }
0x16c7   :  { %2787 = vmatprep.mubr.msk.f32.mxu0 %vm3113_vm2, %v3114_v14 }
0x170d   :  { %v1423_v18 = vpop.permute.xlu1 %1422 }
0x170e   :  { %v1425_v20 = vmul.f32 %v3069_v17, %v1423_v18  ;;  %v1644_v17 = vld [vmem:[#allocation2 + $0x20] sm:$0xff] }
0x1710   :  { %1427 = vrot.lane.b32.xlu1 %v1425_v20, %s3115_s26 }
0x1782   :  { %v1428_v21 = vpop.permute.xlu1 %1427 }
0x1783   :  { %v1430_v8 = vadd.f32 %v1428_v21, %v1338_v7 }
0x1785   :  { %3070 = vtanh.f32 %v1430_v8 }
0x178f   :  { %v3071_v22 = vpop.eup %3070 }
0x1790   :  { %1434 = vrot.lane.b32.xlu1 %v3071_v22, %s3116_s27 }
0x1799   :  { %v2756_v23 = vpop.f32.mrb[16].mxu0 }
0x179a   :  { %v1219_v24 = vadd.f32 %v2756_v23, %v3423_v50  ;;  %v1213_v25 = vpop.f32.mrb[17].mxu0 }
0x179b   :  { %v1214_v13 = vadd.f32 %v3423_v50, %v1213_v25 }
0x179c   :  { %1229 = vst.msk [vmem:[#allocation2 + $0x38] sm:$0xff] %vm220_vm3, %v1219_v24 }
0x179d   :  { %1228 = vst.msk [vmem:[#allocation2 + $0x30] sm:$0xff] %vm220_vm3, %v1214_v13 }
0x1802   :  { %v1435_v29 = vpop.permute.xlu1 %1434 }
0x1803   :  { %v1437_v31 = vmul.f32 %v1435_v29, %v1432_v26 }
0x1805   :  { %v1439_v32 = vadd.f32 %v1438_v30, %v1437_v31 }
0x1807   :  { %1442 = vrot.lane.b32.xlu1 %v1439_v32, %s3116_s27 }
0x1879   :  { %v1443_v33 = vpop.permute.xlu1 %1442 }
0x187a   :  { %2788 = vmatmul.mubr.msk.f32.vlgmr.msra.gmra.mrb[18].mxu0 %vm241_vm4, %v1443_v33 }
0x187b   :  { %2965 = vmatpush3.bf16.msra.mxu0 %v3445_v16  ;;  %2809 = vmatprep.mubr.msk.f32.mxu0 %vm3113_vm2, %v3114_v14 }
0x187c   :  { %2966 = vmatprep.subr.bf16.mxu0 %v3112_v11 }
0x187f   :  { %2968 = vmatpush3.bf16.msra.mxu0 %v3455_v19 }
0x1880   :  { %2975 = vmatprep.subr.bf16.mxu0 %v3112_v11 }
0x194d   :  { %v1512_v50 = vpop.f32.mrb[18].mxu0 }
0x194e   :  { %v1513_v34 = vadd.f32 %v3483_v27, %v1512_v50  ;;  %v2789_v35 = vpop.f32.mrb[19].mxu0 }
0x1950   :  { %1524 = vrot.lane.b32.xlu0 %v1513_v34, %s3115_s26  ;;  %v1516_v37 = vadd.f32 %v1513_v34, %v1440_v36 }
0x1952   :  { %v2494_v38 = vmul.f32 -1.442695, %v1516_v37  ;;  %v1746_v37 = vld [vmem:[#allocation2 + $0x28] sm:$0xff] }
0x1954   :  { %3072 = vpow2.f32 %v2494_v38 }
0x195e   :  { %v3073_v39 = vpop.eup %3072 }
0x195f   :  { %v1520_v40 = vadd.f32 1.0, %v3073_v39 }
0x1961   :  { %3074 = vrcp.f32 %v1520_v40 }
0x196b   :  { %v3075_v41 = vpop.eup %3074 }
0x196c   :  { %v1534_v47 = vsub.f32 1.0, %v3075_v41  ;;  %v1540_v49 = vmul.f32 %v3075_v41, %v1439_v32 }
0x19c2   :  { %v1525_v42 = vpop.permute.xlu0 %1524 }
0x19c3   :  { %v1527_v43 = vmul.f32 %v3075_v41, %v1525_v42 }
0x19c5   :  { %1529 = vrot.lane.b32.xlu1 %v1527_v43, %s3115_s26 }
0x1a37   :  { %v1530_v44 = vpop.permute.xlu1 %1529 }
0x1a38   :  { %v1532_v45 = vadd.f32 %v1530_v44, %v1440_v36 }
0x1a3a   :  { %3076 = vtanh.f32 %v1532_v45 }
0x1a44   :  { %v3077_v46 = vpop.eup %3076 }
0x1a45   :  { %1536 = vrot.lane.b32.xlu0 %v3077_v46, %s3116_s27 }
0x1ab7   :  { %v1537_v48 = vpop.permute.xlu0 %1536 }
0x1ab8   :  { %v1539_v51 = vmul.f32 %v1537_v48, %v1534_v47 }
0x1aba   :  { %v1541_v52 = vadd.f32 %v1540_v49, %v1539_v51 }
0x1abc   :  { %1544 = vrot.lane.b32.xlu1 %v1541_v52, %s3116_s27 }
0x1b2e   :  { %v1545_v53 = vpop.permute.xlu1 %1544 }
0x1b2f   :  { %2799 = vmatmul.mubr.msk.f32.vlgmr.msra.gmra.mrb[18].mxu1 %vm241_vm4, %v1545_v53 }
0x1b30   :  { %2971 = vmatpush3.bf16.msra.mxu1 %v3445_v16  ;;  %2820 = vmatprep.mubr.msk.f32.mxu1 %vm3113_vm2, %v3114_v14 }
0x1b31   :  { %2972 = vmatprep.subr.bf16.mxu1 %v3112_v11 }
0x1b34   :  { %2974 = vmatpush3.bf16.msra.mxu1 %v3455_v19 }
0x1b35   :  { %2981 = vmatprep.subr.bf16.mxu1 %v3112_v11 }
0x1c02   :  { %v1614_v54 = vpop.f32.mrb[18].mxu1 }
0x1c03   :  { %v1615_v55 = vadd.f32 %v3483_v27, %v1614_v54  ;;  %v2800_v56 = vpop.f32.mrb[19].mxu1 }
0x1c04   :  { %v1848_v56 = vld [vmem:[#allocation2 + $0x30] sm:$0xff] }
0x1c05   :  { %1626 = vrot.lane.b32.xlu0 %v1615_v55, %s3115_s26  ;;  %v1618_v28 = vadd.f32 %v1615_v55, %v1542_v57 }
0x1c07   :  { %v2496_v58 = vmul.f32 -1.442695, %v1618_v28 }
0x1c09   :  { %3078 = vpow2.f32 %v2496_v58 }
0x1c13   :  { %v3079_v59 = vpop.eup %3078 }
0x1c14   :  { %v1622_v60 = vadd.f32 1.0, %v3079_v59 }
0x1c16   :  { %3080 = vrcp.f32 %v1622_v60 }
0x1c20   :  { %v3081_v61 = vpop.eup %3080 }
0x1c21   :  { %v1636_v3 = vsub.f32 1.0, %v3081_v61  ;;  %v1642_v5 = vmul.f32 %v3081_v61, %v1541_v52 }
0x1c77   :  { %v1627_v62 = vpop.permute.xlu0 %1626 }
0x1c78   :  { %v1629_v63 = vmul.f32 %v3081_v61, %v1627_v62 }
0x1c7a   :  { %1631 = vrot.lane.b32.xlu1 %v1629_v63, %s3115_s26 }
0x1cec   :  { %v1632_v0 = vpop.permute.xlu1 %1631 }
0x1ced   :  { %v1634_v1 = vadd.f32 %v1632_v0, %v1542_v57 }
0x1cef   :  { %3082 = vtanh.f32 %v1634_v1 }
0x1cf9   :  { %v3083_v2 = vpop.eup %3082 }
0x1cfa   :  { %1638 = vrot.lane.b32.xlu0 %v3083_v2, %s3116_s27 }
0x1d6c   :  { %v1639_v4 = vpop.permute.xlu0 %1638 }
0x1d6d   :  { %v1641_v6 = vmul.f32 %v1639_v4, %v1636_v3 }
0x1d6f   :  { %v1643_v7 = vadd.f32 %v1642_v5, %v1641_v6 }
0x1d71   :  { %1646 = vrot.lane.b32.xlu1 %v1643_v7, %s3116_s27 }
0x1de3   :  { %v1647_v9 = vpop.permute.xlu1 %1646 }
0x1de4   :  { %2810 = vmatmul.mubr.msk.f32.vlgmr.msra.gmra.mrb[20].mxu0 %vm241_vm4, %v1647_v9 }
0x1de5   :  { %2977 = vmatpush3.bf16.msra.mxu0 %v3445_v16  ;;  %2831 = vmatprep.mubr.msk.f32.mxu0 %vm3113_vm2, %v3114_v14 }
0x1de6   :  { %2978 = vmatprep.subr.bf16.mxu0 %v3112_v11 }
0x1de9   :  { %2980 = vmatpush3.bf16.msra.mxu0 %v3455_v19 }
0x1dea   :  { %2845 = vmatprep.subr.mxu0 %v3114_v14 }
0x1eb7   :  { %v1716_v10 = vpop.f32.mrb[20].mxu0 }
0x1eb8   :  { %v1717_v12 = vadd.f32 %v3483_v27, %v1716_v10  ;;  %v2811_v15 = vpop.f32.mrb[21].mxu0 }
0x1eb9   :  { %v1950_v15 = vld [vmem:[#allocation2 + $0x38] sm:$0xff] }
0x1eba   :  { %1728 = vrot.lane.b32.xlu0 %v1717_v12, %s3115_s26  ;;  %v1720_v18 = vadd.f32 %v1717_v12, %v1644_v17 }
0x1ebc   :  { %v2498_v20 = vmul.f32 -1.442695, %v1720_v18 }
0x1ebe   :  { %3084 = vpow2.f32 %v2498_v20 }
0x1ec8   :  { %v3085_v21 = vpop.eup %3084 }
0x1ec9   :  { %v1724_v8 = vadd.f32 1.0, %v3085_v21 }
0x1ecb   :  { %3086 = vrcp.f32 %v1724_v8 }
0x1ed5   :  { %v3087_v22 = vpop.eup %3086 }
0x1ed6   :  { %v1738_v29 = vsub.f32 1.0, %v3087_v22  ;;  %v1744_v31 = vmul.f32 %v3087_v22, %v1643_v7 }
0x1f2c   :  { %v1729_v23 = vpop.permute.xlu0 %1728 }
0x1f2d   :  { %v1731_v24 = vmul.f32 %v3087_v22, %v1729_v23 }
0x1f2f   :  { %1733 = vrot.lane.b32.xlu1 %v1731_v24, %s3115_s26 }
0x1fa1   :  { %v1734_v25 = vpop.permute.xlu1 %1733 }
0x1fa2   :  { %v1736_v13 = vadd.f32 %v1734_v25, %v1644_v17 }
0x1fa4   :  { %3088 = vtanh.f32 %v1736_v13  ;;  %v2056_v13 = vld [vmem:[%s3672_s1] sm:$0xff] }
0x1fae   :  { %v3089_v26 = vpop.eup %3088 }
0x1faf   :  { %1740 = vrot.lane.b32.xlu0 %v3089_v26, %s3116_s27  ;;  %v2052_v26 = vld [vmem:[%s3673_s10] sm:$0xff] }
0x2021   :  { %v1741_v30 = vpop.permute.xlu0 %1740 }
0x2022   :  { %v1743_v32 = vmul.f32 %v1741_v30, %v1738_v29  ;;  %v2053_v29 = vld [vmem:[%s3673_s10 + $0x8] sm:$0xff]  ;;  %v2054_v30 = vld [vmem:[%s3673_s10 + $0x10] sm:$0xff] }
0x2024   :  { %v1745_v33 = vadd.f32 %v1744_v31, %v1743_v32  ;;  %v2055_v31 = vld [vmem:[%s3673_s10 + $0x18] sm:$0xff]  ;;  %v2988_v32 = vpack.c.bf16 %v2053_v29, %v2052_v26  ;;  %v2514_v29 = vld [vmem:[%s3682_s18] ss:$0 sm:$0xff] }
0x2026   :  { %1748 = vrot.lane.b32.xlu1 %v1745_v33, %s3116_s27 }
0x2098   :  { %v1749_v50 = vpop.permute.xlu1 %1748 }
0x2099   :  { %2821 = vmatmul.mubr.msk.f32.vlgmr.msra.gmra.mrb[20].mxu1 %vm241_vm4, %v1749_v50 }
0x209a   :  { %2983 = vmatpush3.bf16.msra.mxu1 %v3445_v16  ;;  %2842 = vmatprep.mubr.msk.f32.mxu1 %vm3113_vm2, %v3114_v14 }
0x209b   :  { %2984 = vmatprep.subr.bf16.mxu1 %v3112_v11 }
0x209e   :  { %2986 = vmatpush3.bf16.msra.mxu1 %v3455_v19 }
0x209f   :  { %2993 = vmatprep.subr.bf16.mxu1 %v3112_v11 }
0x216c   :  { %v1818_v34 = vpop.f32.mrb[20].mxu1 }
0x216d   :  { %v1819_v35 = vadd.f32 %v3483_v27, %v1818_v34  ;;  %v2822_v36 = vpop.f32.mrb[21].mxu1 }
0x216f   :  { %1830 = vrot.lane.b32.xlu0 %v1819_v35, %s3115_s26  ;;  %v1822_v38 = vadd.f32 %v1819_v35, %v1746_v37 }
0x2171   :  { %v2500_v39 = vmul.f32 -1.442695, %v1822_v38 }
0x2173   :  { %3090 = vpow2.f32 %v2500_v39 }
0x217d   :  { %v3091_v16 = vpop.eup %3090 }
0x217e   :  { %v1826_v40 = vadd.f32 1.0, %v3091_v16 }
0x2180   :  { %3092 = vrcp.f32 %v1826_v40 }
0x218a   :  { %v3093_v41 = vpop.eup %3092 }
0x218b   :  { %v1840_v46 = vsub.f32 1.0, %v3093_v41  ;;  %v1846_v48 = vmul.f32 %v3093_v41, %v1745_v33  ;;  %v2991_v33 = vpack.c.bf16 %v2055_v31, %v2054_v30 }
0x21e1   :  { %v1831_v42 = vpop.permute.xlu0 %1830 }
0x21e2   :  { %v1833_v43 = vmul.f32 %v3093_v41, %v1831_v42  ;;  %v2508_v42 = vld [vmem:[%s3674_s12] ss:$0 sm:$0xff] }
0x21e4   :  { %1835 = vrot.lane.b32.xlu1 %v1833_v43, %s3115_s26 }
0x2256   :  { %v1836_v19 = vpop.permute.xlu1 %1835 }
0x2257   :  { %v1838_v44 = vadd.f32 %v1836_v19, %v1746_v37 }
0x2259   :  { %3094 = vtanh.f32 %v1838_v44 }
0x2263   :  { %v3095_v45 = vpop.eup %3094 }
0x2264   :  { %1842 = vrot.lane.b32.xlu0 %v3095_v45, %s3116_s27 }
0x22d6   :  { %v1843_v47 = vpop.permute.xlu0 %1842 }
0x22d7   :  { %v1845_v49 = vmul.f32 %v1843_v47, %v1840_v46 }
0x22d9   :  { %v1847_v51 = vadd.f32 %v1846_v48, %v1845_v49 }
0x22db   :  { %1850 = vrot.lane.b32.xlu1 %v1847_v51, %s3116_s27 }
0x234d   :  { %v1851_v52 = vpop.permute.xlu1 %1850 }
0x234e   :  { %2832 = vmatmul.mubr.msk.f32.vlgmr.msra.gmra.mrb[22].mxu0 %vm241_vm4, %v1851_v52  ;;  %v2251_v52 = vld [vmem:[%s3675_s15 + $0x8] sm:$0xff] }
0x234f   :  { %2847 = vmatprep.mubr.msk.f32.mxu0 %vm3113_vm2, %v3114_v14 }
0x2421   :  { %v1920_v53 = vpop.f32.mrb[22].mxu0 }
0x2422   :  { %v1921_v54 = vadd.f32 %v3483_v27, %v1920_v53  ;;  %v2833_v55 = vpop.f32.mrb[23].mxu0 }
0x2423   :  { %v2253_v55 = vld [vmem:[%s3675_s15 + $0x18] sm:$0xff] }
0x2424   :  { %1932 = vrot.lane.b32.xlu0 %v1921_v54, %s3115_s26  ;;  %v1924_v57 = vadd.f32 %v1921_v54, %v1848_v56  ;;  %v2252_v54 = vld [vmem:[%s3675_s15 + $0x10] sm:$0xff] }
0x2426   :  { %v2502_v28 = vmul.f32 -1.442695, %v1924_v57 }
0x2428   :  { %3096 = vpow2.f32 %v2502_v28 }
0x2432   :  { %v3097_v58 = vpop.eup %3096 }
0x2433   :  { %v1928_v59 = vadd.f32 1.0, %v3097_v58 }
0x2435   :  { %3098 = vrcp.f32 %v1928_v59 }
0x243f   :  { %v3099_v60 = vpop.eup %3098 }
0x2440   :  { %v1942_v2 = vsub.f32 1.0, %v3099_v60  ;;  %v1948_v4 = vmul.f32 %v3099_v60, %v1847_v51 }
0x2496   :  { %v1933_v61 = vpop.permute.xlu0 %1932 }
0x2497   :  { %v1935_v62 = vmul.f32 %v3099_v60, %v1933_v61  ;;  %v2509_v60 = vld [vmem:[%s3676_s13] ss:$0 sm:$0xff] }
0x2499   :  { %1937 = vrot.lane.b32.xlu1 %v1935_v62, %s3115_s26  ;;  %v2510_v62 = vld [vmem:[%s3677_s14] ss:$0 sm:$0xff] }
0x250b   :  { %v1938_v63 = vpop.permute.xlu1 %1937 }
0x250c   :  { %v1940_v0 = vadd.f32 %v1938_v63, %v1848_v56  ;;  %v2997_v56 = vpack.c.bf16 %v2253_v55, %v2252_v54 }
0x250e   :  { %3100 = vtanh.f32 %v1940_v0 }
0x2518   :  { %v3101_v1 = vpop.eup %3100 }
0x2519   :  { %1944 = vrot.lane.b32.xlu0 %v3101_v1, %s3116_s27 }
0x258b   :  { %v1945_v3 = vpop.permute.xlu0 %1944 }
0x258c   :  { %v1947_v5 = vmul.f32 %v1945_v3, %v1942_v2  ;;  %v2511_v2 = vld [vmem:[%s3678_s16] ss:$0 sm:$0xff] }
0x258e   :  { %v1949_v6 = vadd.f32 %v1948_v4, %v1947_v5 }
0x2590   :  { %1952 = vrot.lane.b32.xlu1 %v1949_v6, %s3116_s27 }
0x2602   :  { %v1953_v7 = vpop.permute.xlu1 %1952 }
0x2603   :  { %2843 = vmatmul.mubr.msk.f32.vlgmr.msra.gmra.mrb[22].mxu1 %vm241_vm4, %v1953_v7 }
0x2604   :  { %2869 = vmatprep.mubr.msk.f32.mxu1 %vm3113_vm2, %v3114_v14 }
0x26d6   :  { %v2022_v9 = vpop.f32.mrb[22].mxu1 }
0x26d7   :  { %v2023_v10 = vadd.f32 %v3483_v27, %v2022_v9  ;;  %v2844_v12 = vpop.f32.mrb[23].mxu1  ;;  %v2057_v27 = vld [vmem:[%s3671_s11] sm:$0xf] }
0x26d8   :  { %2846 = vmatpush3.msk.msra.mxu0 %vm2062_vm5, %v2057_v27 }
0x26d9   :  { %2034 = vrot.lane.b32.xlu0 %v2023_v10, %s3115_s26  ;;  %v2026_v17 = vadd.f32 %v2023_v10, %v1950_v15  ;;  %2987 = vmatprep.subr.bf16.mxu0 %v3112_v11 }
0x26da   :  { %2848 = vmatmul.mubr.msk.f32.vlgmr.msra.gmra.mrb[24].mxu0 %vm2058_vm6, %v2056_v13  ;;  %v2513_v13 = vld [vmem:[%s3681_s17] ss:$0 sm:$0xff] }
0x26db   :  { %v2504_v18 = vmul.f32 -1.442695, %v2026_v17  ;;  %2858 = vmatprep.mubr.msk.f32.mxu0 %vm3113_vm2, %v3114_v14  ;;  %2989 = vmatpush3.bf16.msra.mxu0 %v2988_v32  ;;  %v2364_v17 = vld [vmem:[%s3679_s19] sm:$0xff] }
0x26dc   :  { %2990 = vmatprep.subr.bf16.mxu0 %v3112_v11 }
0x26dd   :  { %3102 = vpow2.f32 %v2504_v18  ;;  %v2365_v18 = vld [vmem:[%s3679_s19 + $0x8] sm:$0xff] }
0x26df   :  { %2992 = vmatpush3.bf16.msra.mxu0 %v2991_v33 }
0x26e0   :  { %2999 = vmatprep.subr.bf16.mxu0 %v3112_v11 }
0x26e7   :  { %v3103_v20 = vpop.eup %3102 }
0x26e8   :  { %v2030_v21 = vadd.f32 1.0, %v3103_v20  ;;  %v3000_v20 = vpack.c.bf16 %v2365_v18, %v2364_v17 }
0x26ea   :  { %3104 = vrcp.f32 %v2030_v21  ;;  %v2366_v21 = vld [vmem:[%s3679_s19 + $0x10] sm:$0xff] }
0x26f4   :  { %v3105_v8 = vpop.eup %3104 }
0x26f5   :  { %v2044_v34 = vsub.f32 1.0, %v3105_v8  ;;  %v2050_v36 = vmul.f32 %v3105_v8, %v1949_v6 }
0x274b   :  { %v2035_v22 = vpop.permute.xlu0 %2034 }
0x274c   :  { %v2037_v23 = vmul.f32 %v3105_v8, %v2035_v22  ;;  %v2367_v8 = vld [vmem:[%s3679_s19 + $0x18] sm:$0xff] }
0x274d   :  { %v3003_v22 = vpack.c.bf16 %v2367_v8, %v2366_v21 }
0x274e   :  { %2039 = vrot.lane.b32.xlu1 %v2037_v23, %s3115_s26  ;;  %v26_v23 = vstv %s3680_s20 }
0x274f   :  { %27 = vst [vmem:[#allocation4] sm:$0x1] %v26_v23 }
0x2756   :  { %v2515_v33 = vld [vmem:[#allocation4] ss:$0 sm:$0xff] }
0x27ad   :  { %v2132_v39 = vpop.f32.mrb[24].mxu0 }
0x27ae   :  { %v2849_v16 = vpop.f32.mrb[25].mxu0 }
0x27c0   :  { %v2040_v24 = vpop.permute.xlu1 %2039 }
0x27c1   :  { %v2042_v25 = vadd.f32 %v2040_v24, %v1950_v15 }
0x27c3   :  { %3106 = vtanh.f32 %v2042_v25 }
0x27cd   :  { %v3107_v50 = vpop.eup %3106 }
0x27ce   :  { %2046 = vrot.lane.b32.xlu0 %v3107_v50, %s3116_s27 }
0x2840   :  { %v2047_v35 = vpop.permute.xlu0 %2046 }
0x2841   :  { %v2049_v37 = vmul.f32 %v2047_v35, %v2044_v34 }
0x2843   :  { %v2051_v38 = vadd.f32 %v2050_v36, %v2049_v37 }
0x2845   :  { %2137 = vrot.lane.b32.xlu1 %v2051_v38, %s3116_s27 }
0x28b7   :  { %v2138_v40 = vpop.permute.xlu1 %2137 }
0x28b8   :  { %2859 = vmatmul.mubr.msk.f32.vlgmr.msra.gmra.mrb[26].mxu0 %vm241_vm4, %v2138_v40 }
0x28b9   :  { %2880 = vmatprep.mubr.msk.f32.mxu0 %vm3113_vm2, %v3114_v14  ;;  %v2250_v14 = vld [vmem:[%s3675_s15] sm:$0xff]  ;;  %3001 = vmatpush3.bf16.msra.mxu0 %v3000_v20 }
0x28ba   :  { %v2994_v53 = vpack.c.bf16 %v2251_v52, %v2250_v14  ;;  %3002 = vmatprep.subr.bf16.mxu0 %v3112_v11 }
0x28bc   :  { %2995 = vmatpush3.bf16.msra.mxu1 %v2994_v53 }
0x28bd   :  { %2996 = vmatprep.subr.bf16.mxu1 %v3112_v11  ;;  %3004 = vmatpush3.bf16.msra.mxu0 %v3003_v22 }
0x28c0   :  { %2998 = vmatpush3.bf16.msra.mxu1 %v2997_v56 }
0x298b   :  { %v2207_v41 = vpop.f32.mrb[26].mxu0 }
0x298c   :  { %v2208_v43 = vadd.f32 %v2207_v41, %v2132_v39  ;;  %v2860_v19 = vpop.f32.mrb[27].mxu0 }
0x298e   :  { %v2218_v44 = vadd.f32 %v2508_v42, %v2208_v43 }
0x2990   :  { %v2221_v45 = vsel %vm241_vm4, %v2218_v44, 0.0 }
0x2991   :  { %2222 = vadd.xlane.f32.xlu0 %v2221_v45 }
0x2a1e   :  { %v2223_v46 = vpop.xlane.xlu0 %2222 }
0x2a1f   :  { %v2225_v47 = vmul.f32 0.03125, %v2223_v46 }
0x2a21   :  { %v2226_v48 = vsub.f32 %v2218_v44, %v2225_v47 }
0x2a23   :  { %v2227_v49 = vmul.f32 %v2226_v48, %v2226_v48 }
0x2a25   :  { %v2228_v51 = vsel %vm241_vm4, %v2227_v49, 0.0 }
0x2a26   :  { %2229 = vadd.xlane.f32.xlu1 %v2228_v51 }
0x2ab3   :  { %v2230_v57 = vpop.xlane.xlu1 %2229 }
0x2ab4   :  { %v2231_v28 = vmul.f32 0.03125, %v2230_v57 }
0x2ab6   :  { %v2232_v58 = vadd.f32 1e-05, %v2231_v28 }
0x2ab8   :  { %3108 = vrsqrt.f32 %v2232_v58 }
0x2ac2   :  { %v3109_v59 = vpop.eup %3108 }
0x2ac3   :  { %v2234_v61 = vmul.f32 %v3109_v59, %v2226_v48 }
0x2ac5   :  { %v2241_v63 = vmul.f32 %v2509_v60, %v2234_v61 }
0x2ac7   :  { %v2248_v0 = vadd.f32 %v2510_v62, %v2241_v63 }
0x2ac9   :  { %v2249_v1 = vmax.f32 %v2248_v0, 0.0 }
0x2acb   :  { %2870 = vmatmul.mubr.msk.f32.vlgmr.msra.gmra.mrb[24].mxu1 %vm241_vm4, %v2249_v1 }
0x2b9e   :  { %v2330_v3 = vpop.f32.mrb[24].mxu1 }
0x2b9f   :  { %v2331_v4 = vadd.f32 %v2511_v2, %v2330_v3  ;;  %v2871_v5 = vpop.f32.mrb[25].mxu1 }
0x2ba1   :  { %v2336_v6 = vsel %vm241_vm4, %v2331_v4, 0.0 }
0x2ba2   :  { %2337 = vadd.xlane.f32.xlu0 %v2336_v6 }
0x2c2f   :  { %v2338_v7 = vpop.xlane.xlu0 %2337 }
0x2c30   :  { %v2339_v9 = vmul.f32 0.03125, %v2338_v7 }
0x2c32   :  { %v2340_v10 = vsub.f32 %v2331_v4, %v2339_v9 }
0x2c34   :  { %v2341_v12 = vmul.f32 %v2340_v10, %v2340_v10 }
0x2c36   :  { %v2342_v15 = vsel %vm241_vm4, %v2341_v12, 0.0 }
0x2c37   :  { %2343 = vadd.xlane.f32.xlu0 %v2342_v15 }
0x2cc4   :  { %v2344_v24 = vpop.xlane.xlu0 %2343 }
0x2cc5   :  { %v2345_v25 = vmul.f32 0.03125, %v2344_v24 }
0x2cc7   :  { %v2346_v27 = vadd.f32 1e-05, %v2345_v25 }
0x2cc9   :  { %3110 = vrsqrt.f32 %v2346_v27 }
0x2cd3   :  { %v3111_v11 = vpop.eup %3110 }
0x2cd4   :  { %v2348_v26 = vmul.f32 %v3111_v11, %v2340_v10 }
0x2cd6   :  { %v2355_v30 = vmul.f32 %v2513_v13, %v2348_v26 }
0x2cd8   :  { %v2362_v31 = vadd.f32 %v2514_v29, %v2355_v30 }
0x2cda   :  { %v2363_v32 = vmax.f32 %v2362_v31, 0.0 }
0x2cdc   :  { %2881 = vmatmul.mubr.msk.f32.vlgmr.msra.gmra.mrb[28].mxu0 %vm241_vm4, %v2363_v32 }
0x2daf   :  { %v2444_v50 = vpop.f32.mrb[28].mxu0 }
0x2db0   :  { %v2445_v34 = vadd.f32 %v2515_v33, %v2444_v50  ;;  %v2882_v35 = vpop.f32.mrb[29].mxu0 }
0x2db2   :  { %2449 = vst.msk [vmem:[%s3683_s21] sm:$0xff] %vm2448_vm7, %v2445_v34 }

</bundles_post_ra>
